<compile_context>
chip_gen: v6e
topology: v6e:2x2x1
jax: 0.10.0
libtpu: 0.0.40
codegen_flags: <defaults>
</compile_context>

<pallas_src>
import functools

import jax
import jax.numpy as jnp
from jax.experimental import pallas as pl
from jax.experimental.pallas import tpu as pltpu

KH1 = KW1 = 3      # conv1 kernel
KH2 = KW2 = 2      # conv2 kernel


def _round_up(x, m):
    return (x + m - 1) // m * m


def _derive_dims(H, W):
    """Shared shape bookkeeping for the row-major activation layout."""
    H1, W1 = H - KH1 + 1, W - KW1 + 1
    H2, W2 = H1 - KH2 + 1, W1 - KW2 + 1
    roww = W1                                    # row stride of y1/y2 layouts
    rows2 = _round_up(H2 * roww, 8)              # conv2 output rows (incl. junk)
    max_tap = (rows2 - 1) + (KH2 - 1) * roww + (KW2 - 1)
    rows1 = _round_up(max(H1 * roww, max_tap + 1), 8)   # y1 rows (incl. overhang)
    return H1, W1, H2, W2, roww, rows1, rows2


# ----------------------------------------------------------------------------
# One-time weight-side preparation (hoisted out of the jitted forward).
# ----------------------------------------------------------------------------
def prepare_params(params, input_shape):
    C, H, W = input_shape
    F = params["conv1_w"].shape[0]               # 64
    O = params["fc1_w"].shape[0]                 # 10
    H1, W1, H2, W2, roww, rows1, rows2 = _derive_dims(H, W)
    assert params["fc1_w"].shape[1] == F * H2 * W2

    # conv1 weight as a single (KH1*KW1*C, F) im2col matrix (lane = tap*C + c).
    w1p = jnp.transpose(params["conv1_w"], (2, 3, 1, 0)).reshape(KH1 * KW1 * C, F)
    b1p = params["conv1_b"].reshape(1, F)
    # conv2 weights as one (F, F) matrix per tap.
    w2p = jnp.transpose(params["conv2_w"], (2, 3, 1, 0)).reshape(KH2 * KW2, F, F)
    b2p = params["conv2_b"].reshape(1, F)

    # Fold PyTorch's NCHW Flatten + junk-column/row removal into a LANE-DENSE
    # (O_pad, K) FC weight:  wfc[o, (h2*roww + w2)*F + c] = fc1_w[o, c*H2*W2 + h2*W2 + w2]
    # (zero for w2 >= W2 and for the row-padding tail).  K = rows2*F is a
    # multiple of 128, and O is only sublane-padded (10 -> 16), never lane-padded.
    O_pad = _round_up(O, 8)                      # 16
    wfc = params["fc1_w"].reshape(O, F, H2, W2)          # (o, c, h2, w2)
    wfc = jnp.transpose(wfc, (0, 2, 3, 1))               # (o, h2, w2, c)
    wfc = jnp.pad(wfc, ((0, O_pad - O), (0, 0), (0, roww - W2), (0, 0)))
    wfc = wfc.reshape(O_pad, H2 * roww * F)
    wfc = jnp.pad(wfc, ((0, 0), (0, (rows2 - H2 * roww) * F)))   # (O_pad, rows2*F)
    bfc = params["fc1_b"].reshape(1, O)

    return {"w1": w1p, "b1": b1p, "w2": w2p, "b2": b2p, "wfc": wfc, "bfc": bfc}


# ----------------------------------------------------------------------------
# Kernel A: conv1(3x3)+ReLU -> conv2(2x2)+ReLU for ONE batch sample per grid
# step.  conv1 is a single fat-K im2col matmul; conv2 is 4 shifted-window
# matmuls over the VMEM-resident y1 scratch (y1 never touches HBM).
# ----------------------------------------------------------------------------
def _conv_stack_kernel(xim_ref, w1_ref, b1_ref, w2_ref, b2_ref, y2_ref, y1_s,
                       *, roww, rows2):
    # ---- conv1 + ReLU: one (rows1, 36) @ (36, 64) matmul ----
    y1_s[...] = jnp.maximum(
        jnp.dot(xim_ref[...], w1_ref[...], preferred_element_type=jnp.float32)
        + b1_ref[...], 0.0)
    # Padded xim rows are zeros -> tail y1 rows are relu(b1): finite, and they
    # only feed junk y2 entries that the FC weight zero-rows null out.

    # ---- conv2 + ReLU: KH2*KW2 shifted-window matmuls from VMEM scratch ----
    acc = None
    for dy in range(KH2):
        for dx in range(KW2):
            start = dy * roww + dx
            part = jnp.dot(y1_s[start:start + rows2, :], w2_ref[dy * KW2 + dx],
                           preferred_element_type=jnp.float32)
            acc = part if acc is None else acc + part
    y2_ref[...] = jnp.maximum(acc + b2_ref[...], 0.0)


# ----------------------------------------------------------------------------
# Kernel B: fully-connected layer.  Weight is lane-dense (O_pad, K); contract
# over K with a transposed-RHS matmul so the 10/16-wide output dim never
# becomes a lane-padded minor axis of the big operand.
# ----------------------------------------------------------------------------
def _fc_kernel(a_ref, w_ref, b_ref, o_ref):
    res = jax.lax.dot_general(
        a_ref[...], w_ref[...],
        dimension_numbers=(((1,), (1,)), ((), ())),   # (N,K) x (O_pad,K)^T
        preferred_element_type=jnp.float32)
    o_ref[...] = res[:, :o_ref.shape[1]] + b_ref[...]


# ----------------------------------------------------------------------------
# Forward pass of _TracedNet (jitted; takes pre-prepared weights).
# ----------------------------------------------------------------------------
def traced_net_forward(x_nchw, prep):
    N, C, H, W = x_nchw.shape
    F = prep["b1"].shape[1]
    O = prep["bfc"].shape[1]
    H1, W1, H2, W2, roww, rows1, rows2 = _derive_dims(H, W)
    K1 = KH1 * KW1 * C

    # Per-call activation prep: full conv1 im2col of the tiny input.
    # Row = h1*roww + w1, lane = (dy*KW1 + dx)*C + c.
    patches = [x_nchw[:, :, dy:dy + H1, dx:dx + W1]
               for dy in range(KH1) for dx in range(KW1)]       # each (N,C,H1,W1)
    xim = jnp.stack(patches, axis=1)                            # (N, 9, C, H1, W1)
    xim = jnp.transpose(xim, (0, 3, 4, 1, 2)).reshape(N, H1 * roww, K1)
    xim = jnp.pad(xim, ((0, 0), (0, rows1 - H1 * roww), (0, 0)))

    conv_kernel = functools.partial(_conv_stack_kernel, roww=roww, rows2=rows2)
    y2 = pl.pallas_call(
        conv_kernel,
        out_shape=jax.ShapeDtypeStruct((N, rows2, F), jnp.float32),
        grid=(N,),
        in_specs=[
            pl.BlockSpec((None, rows1, K1), lambda n: (n, 0, 0)),
            pl.BlockSpec((K1, F), lambda n: (0, 0)),
            pl.BlockSpec((1, F), lambda n: (0, 0)),
            pl.BlockSpec((KH2 * KW2, F, F), lambda n: (0, 0, 0)),
            pl.BlockSpec((1, F), lambda n: (0, 0)),
        ],
        out_specs=pl.BlockSpec((None, rows2, F), lambda n: (n, 0, 0)),
        scratch_shapes=[pltpu.VMEM((rows1, F), jnp.float32)],
        compiler_params=pltpu.CompilerParams(
            dimension_semantics=("parallel",)),
    )(xim, prep["w1"], prep["b1"], prep["w2"], prep["b2"])

    # NOTE: this reshape merges the 64-lane minor dim into the lane axis, so
    # XLA emits one small (~0.2 MiB) relayout between the two pallas_calls.
    # Accepted knowingly: a bf16 y2 would halve it but risks the 1e-3
    # tolerance on the K~=11k FC contraction.
    flat = y2.reshape(N, rows2 * F)

    out = pl.pallas_call(
        _fc_kernel,
        out_shape=jax.ShapeDtypeStruct((N, O), jnp.float32),
        in_specs=[pl.BlockSpec(memory_space=pltpu.MemorySpace.VMEM)] * 3,
        out_specs=pl.BlockSpec(memory_space=pltpu.MemorySpace.VMEM),
    )(flat, prep["wfc"], prep["bfc"])
    return out


# ----------------------------------------------------------------------------
# Pure-JAX reference (mirrors the PyTorch forward) for the correctness check.
# ----------------------------------------------------------------------------
def reference_forward(x_nchw, params):
    dn = ("NCHW", "OIHW", "NCHW")
    y = jax.lax.conv_general_dilated(
        x_nchw, params["conv1_w"], (1, 1), "VALID", dimension_numbers=dn)
    y = jnp.maximum(y + params["conv1_b"][None, :, None, None], 0.0)
    y = jax.lax.conv_general_dilated(
        y, params["conv2_w"], (1, 1), "VALID", dimension_numbers=dn)
    y = jnp.maximum(y + params["conv2_b"][None, :, None, None], 0.0)
    y = y.reshape(y.shape[0], -1)
    return y @ params["fc1_w"].T + params["fc1_b"]


if __name__ == "__main__":
    # Input (N, C, H, W) = (2, 4, 16, 16), consistent with the module.
    N, C, H, W = 2, 4, 16, 16
    h1, w1 = H - 2, W - 2          # after conv1 (k=3): 14, 14
    h2, w2 = h1 - 1, w1 - 1        # after conv2 (k=2): 13, 13
    fc_in = 64 * h2 * w2           # 64 * 13 * 13 = 10816

    key = jax.random.PRNGKey(0)
    kx, k1, k2, k3, k4, k5, k6 = jax.random.split(key, 7)

    x = jax.random.normal(kx, (N, C, H, W), dtype=jnp.float32)
    params = {
        "conv1_w": 0.1 * jax.random.normal(k1, (64, C, 3, 3), dtype=jnp.float32),
        "conv1_b": 0.1 * jax.random.normal(k2, (64,), dtype=jnp.float32),
        "conv2_w": 0.1 * jax.random.normal(k3, (64, 64, 2, 2), dtype=jnp.float32),
        "conv2_b": 0.1 * jax.random.normal(k4, (64,), dtype=jnp.float32),
        "fc1_w": 0.02 * jax.random.normal(k5, (10, fc_in), dtype=jnp.float32),
        "fc1_b": 0.02 * jax.random.normal(k6, (10,), dtype=jnp.float32),
    }

    # One-time weight-side preparation, hoisted out of the jitted forward.
    prep = jax.block_until_ready(prepare_params(params, (C, H, W)))

    forward = jax.jit(traced_net_forward)
    out = jax.block_until_ready(forward(x, prep))
    assert out.shape == (N, 10), out.shape

    ref = jax.block_until_ready(reference_forward(x, params))
    assert jnp.allclose(out, ref, rtol=1e-3, atol=1e-3), (
        "Pallas output mismatch vs reference")

    print("KERNEL_OK")
</pallas_src>

<mosaic_0001>
module attributes {stable_mosaic.version = 11 : i64} {
  func.func @_conv_stack_kernel(%arg0: i32, %arg1: memref<1x200x36xf32, #tpu.memory_space<vmem>>, %arg2: memref<36x64xf32, #tpu.memory_space<vmem>>, %arg3: memref<1x64xf32, #tpu.memory_space<vmem>>, %arg4: memref<4x64x64xf32, #tpu.memory_space<vmem>>, %arg5: memref<1x64xf32, #tpu.memory_space<vmem>>, %arg6: memref<1x184x64xf32, #tpu.memory_space<vmem>>, %arg7: memref<200x64xf32, #tpu.memory_space<vmem>>) attributes {dimension_semantics = [#tpu.dimension_semantics<parallel>], iteration_bounds = array<i64: 2>, scalar_prefetch = 0 : i64, scratch_operands = 1 : i64, tpu.core_type = #tpu.core_type<tc>, window_params = [{transform_indices = @transform_0, window_bounds = array<i64: 1, 200, 36>}, {pipeline_mode = #tpu.pipeline_mode<synchronous>, transform_indices = @transform_1, window_bounds = array<i64: 36, 64>}, {pipeline_mode = #tpu.pipeline_mode<synchronous>, transform_indices = @transform_2, window_bounds = array<i64: 1, 64>}, {pipeline_mode = #tpu.pipeline_mode<synchronous>, transform_indices = @transform_3, window_bounds = array<i64: 4, 64, 64>}, {pipeline_mode = #tpu.pipeline_mode<synchronous>, transform_indices = @transform_4, window_bounds = array<i64: 1, 64>}, {transform_indices = @transform_5, window_bounds = array<i64: 1, 184, 64>}]} {
    %c0 = arith.constant 0 : index
    %c0_0 = arith.constant 0 : index
    %c0_1 = arith.constant 0 : index
    %0 = vector.load %arg1[%c0, %c0_0, %c0_1] : memref<1x200x36xf32, #tpu.memory_space<vmem>>, vector<1x200x36xf32>
    %1 = vector.shape_cast %0 : vector<1x200x36xf32> to vector<200x36xf32>
    %c0_2 = arith.constant 0 : index
    %c0_3 = arith.constant 0 : index
    %2 = vector.load %arg2[%c0_2, %c0_3] : memref<36x64xf32, #tpu.memory_space<vmem>>, vector<36x64xf32>
    %cst = arith.constant dense<0.000000e+00> : vector<200x64xf32>
    %3 = tpu.matmul %1, %2, %cst {dimension_numbers = #tpu.dot_dimension_numbers<[1], [0], [0], [1], [0, 0, 1, 1], [], []>} : vector<200x36xf32>, vector<36x64xf32>, vector<200x64xf32> -> vector<200x64xf32>
    %c0_4 = arith.constant 0 : index
    %c0_5 = arith.constant 0 : index
    %4 = vector.load %arg3[%c0_4, %c0_5] : memref<1x64xf32, #tpu.memory_space<vmem>>, vector<1x64xf32>
    %5 = vector.broadcast %4 : vector<1x64xf32> to vector<200x64xf32>
    %6 = arith.addf %3, %5 : vector<200x64xf32>
    %cst_6 = arith.constant 0.000000e+00 : f32
    %7 = vector.broadcast %cst_6 : f32 to vector<200x64xf32>
    %8 = arith.maximumf %6, %7 : vector<200x64xf32>
    %c0_7 = arith.constant 0 : index
    %c0_8 = arith.constant 0 : index
    %9 = vector.load %arg7[%c0_7, %c0_8] : memref<200x64xf32, #tpu.memory_space<vmem>>, vector<200x64xf32>
    tpu.vector_store %arg7[%c0_7, %c0_8], %8 {strides = array<i32>} : memref<200x64xf32, #tpu.memory_space<vmem>>, vector<200x64xf32>,
    %c0_9 = arith.constant 0 : index
    %c0_10 = arith.constant 0 : index
    %10 = vector.load %arg7[%c0_9, %c0_10] : memref<200x64xf32, #tpu.memory_space<vmem>>, vector<184x64xf32>
    %c0_11 = arith.constant 0 : index
    %c0_12 = arith.constant 0 : index
    %c0_13 = arith.constant 0 : index
    %11 = vector.load %arg4[%c0_11, %c0_12, %c0_13] : memref<4x64x64xf32, #tpu.memory_space<vmem>>, vector<1x64x64xf32>
    %12 = vector.shape_cast %11 : vector<1x64x64xf32> to vector<64x64xf32>
    %cst_14 = arith.constant dense<0.000000e+00> : vector<184x64xf32>
    %13 = tpu.matmul %10, %12, %cst_14 {dimension_numbers = #tpu.dot_dimension_numbers<[1], [0], [0], [1], [0, 0, 1, 1], [], []>} : vector<184x64xf32>, vector<64x64xf32>, vector<184x64xf32> -> vector<184x64xf32>
    %c1 = arith.constant 1 : index
    %c0_15 = arith.constant 0 : index
    %14 = vector.load %arg7[%c1, %c0_15] : memref<200x64xf32, #tpu.memory_space<vmem>>, vector<184x64xf32>
    %c1_16 = arith.constant 1 : index
    %c0_17 = arith.constant 0 : index
    %c0_18 = arith.constant 0 : index
    %15 = vector.load %arg4[%c1_16, %c0_17, %c0_18] : memref<4x64x64xf32, #tpu.memory_space<vmem>>, vector<1x64x64xf32>
    %16 = vector.shape_cast %15 : vector<1x64x64xf32> to vector<64x64xf32>
    %cst_19 = arith.constant dense<0.000000e+00> : vector<184x64xf32>
    %17 = tpu.matmul %14, %16, %cst_19 {dimension_numbers = #tpu.dot_dimension_numbers<[1], [0], [0], [1], [0, 0, 1, 1], [], []>} : vector<184x64xf32>, vector<64x64xf32>, vector<184x64xf32> -> vector<184x64xf32>
    %18 = arith.addf %13, %17 : vector<184x64xf32>
    %c14 = arith.constant 14 : index
    %c0_20 = arith.constant 0 : index
    %19 = vector.load %arg7[%c14, %c0_20] : memref<200x64xf32, #tpu.memory_space<vmem>>, vector<184x64xf32>
    %c2 = arith.constant 2 : index
    %c0_21 = arith.constant 0 : index
    %c0_22 = arith.constant 0 : index
    %20 = vector.load %arg4[%c2, %c0_21, %c0_22] : memref<4x64x64xf32, #tpu.memory_space<vmem>>, vector<1x64x64xf32>
    %21 = vector.shape_cast %20 : vector<1x64x64xf32> to vector<64x64xf32>
    %cst_23 = arith.constant dense<0.000000e+00> : vector<184x64xf32>
    %22 = tpu.matmul %19, %21, %cst_23 {dimension_numbers = #tpu.dot_dimension_numbers<[1], [0], [0], [1], [0, 0, 1, 1], [], []>} : vector<184x64xf32>, vector<64x64xf32>, vector<184x64xf32> -> vector<184x64xf32>
    %23 = arith.addf %18, %22 : vector<184x64xf32>
    %c15 = arith.constant 15 : index
    %c0_24 = arith.constant 0 : index
    %24 = vector.load %arg7[%c15, %c0_24] : memref<200x64xf32, #tpu.memory_space<vmem>>, vector<184x64xf32>
    %c3 = arith.constant 3 : index
    %c0_25 = arith.constant 0 : index
    %c0_26 = arith.constant 0 : index
    %25 = vector.load %arg4[%c3, %c0_25, %c0_26] : memref<4x64x64xf32, #tpu.memory_space<vmem>>, vector<1x64x64xf32>
    %26 = vector.shape_cast %25 : vector<1x64x64xf32> to vector<64x64xf32>
    %cst_27 = arith.constant dense<0.000000e+00> : vector<184x64xf32>
    %27 = tpu.matmul %24, %26, %cst_27 {dimension_numbers = #tpu.dot_dimension_numbers<[1], [0], [0], [1], [0, 0, 1, 1], [], []>} : vector<184x64xf32>, vector<64x64xf32>, vector<184x64xf32> -> vector<184x64xf32>
    %28 = arith.addf %23, %27 : vector<184x64xf32>
    %c0_28 = arith.constant 0 : index
    %c0_29 = arith.constant 0 : index
    %29 = vector.load %arg5[%c0_28, %c0_29] : memref<1x64xf32, #tpu.memory_space<vmem>>, vector<1x64xf32>
    %30 = vector.broadcast %29 : vector<1x64xf32> to vector<184x64xf32>
    %31 = arith.addf %28, %30 : vector<184x64xf32>
    %cst_30 = arith.constant 0.000000e+00 : f32
    %32 = vector.broadcast %cst_30 : f32 to vector<184x64xf32>
    %33 = arith.maximumf %31, %32 : vector<184x64xf32>
    %c0_31 = arith.constant 0 : index
    %c0_32 = arith.constant 0 : index
    %c0_33 = arith.constant 0 : index
    %34 = vector.load %arg6[%c0_31, %c0_32, %c0_33] : memref<1x184x64xf32, #tpu.memory_space<vmem>>, vector<1x184x64xf32>
    %35 = vector.shape_cast %34 : vector<1x184x64xf32> to vector<184x64xf32>
    %36 = vector.shape_cast %33 : vector<184x64xf32> to vector<1x184x64xf32>
    tpu.vector_store %arg6[%c0_31, %c0_32, %c0_33], %36 {strides = array<i32>} : memref<1x184x64xf32, #tpu.memory_space<vmem>>, vector<1x184x64xf32>,
    return
  }
  func.func @transform_0(%arg0: i32) -> (i32, i32, i32) {
    %c0_i32 = arith.constant 0 : i32
    %c0_i32_0 = arith.constant 0 : i32
    %c0_i32_1 = arith.constant 0 : i32
    return %arg0, %c0_i32, %c0_i32_0 : i32, i32, i32
  }
  func.func @transform_1(%arg0: i32) -> (i32, i32) {
    %c0_i32 = arith.constant 0 : i32
    %c0_i32_0 = arith.constant 0 : i32
    %c0_i32_1 = arith.constant 0 : i32
    return %c0_i32, %c0_i32_0 : i32, i32
  }
  func.func @transform_2(%arg0: i32) -> (i32, i32) {
    %c0_i32 = arith.constant 0 : i32
    %c0_i32_0 = arith.constant 0 : i32
    %c0_i32_1 = arith.constant 0 : i32
    return %c0_i32, %c0_i32_0 : i32, i32
  }
  func.func @transform_3(%arg0: i32) -> (i32, i32, i32) {
    %c0_i32 = arith.constant 0 : i32
    %c0_i32_0 = arith.constant 0 : i32
    %c0_i32_1 = arith.constant 0 : i32
    %c0_i32_2 = arith.constant 0 : i32
    return %c0_i32, %c0_i32_0, %c0_i32_1 : i32, i32, i32
  }
  func.func @transform_4(%arg0: i32) -> (i32, i32) {
    %c0_i32 = arith.constant 0 : i32
    %c0_i32_0 = arith.constant 0 : i32
    %c0_i32_1 = arith.constant 0 : i32
    return %c0_i32, %c0_i32_0 : i32, i32
  }
  func.func @transform_5(%arg0: i32) -> (i32, i32, i32) {
    %c0_i32 = arith.constant 0 : i32
    %c0_i32_0 = arith.constant 0 : i32
    %c0_i32_1 = arith.constant 0 : i32
    return %arg0, %c0_i32, %c0_i32_0 : i32, i32, i32
  }
}

module attributes {stable_mosaic.version = 11 : i64} {
  func.func @_fc_kernel(%arg0: memref<2x11776xf32, #tpu.memory_space<vmem>>, %arg1: memref<16x11776xf32, #tpu.memory_space<vmem>>, %arg2: memref<1x10xf32, #tpu.memory_space<vmem>>, %arg3: memref<2x10xf32, #tpu.memory_space<vmem>>) attributes {dimension_semantics = [], scalar_prefetch = 0 : i64, scratch_operands = 0 : i64, tpu.core_type = #tpu.core_type<tc>} {
    %c0 = arith.constant 0 : index
    %c0_0 = arith.constant 0 : index
    %0 = vector.load %arg0[%c0, %c0_0] : memref<2x11776xf32, #tpu.memory_space<vmem>>, vector<2x11776xf32>
    %c0_1 = arith.constant 0 : index
    %c0_2 = arith.constant 0 : index
    %1 = vector.load %arg1[%c0_1, %c0_2] : memref<16x11776xf32, #tpu.memory_space<vmem>>, vector<16x11776xf32>
    %cst = arith.constant dense<0.000000e+00> : vector<2x16xf32>
    %2 = tpu.matmul %0, %1, %cst {dimension_numbers = #tpu.dot_dimension_numbers<[1], [1], [0], [0], [0, 0, 1, 0], [], []>} : vector<2x11776xf32>, vector<16x11776xf32>, vector<2x16xf32> -> vector<2x16xf32>
    %3 = vector.extract_strided_slice %2 {offsets = [0, 0], sizes = [2, 10], strides = [1, 1]} : vector<2x16xf32> to vector<2x10xf32>
    %c0_3 = arith.constant 0 : index
    %c0_4 = arith.constant 0 : index
    %4 = vector.load %arg2[%c0_3, %c0_4] : memref<1x10xf32, #tpu.memory_space<vmem>>, vector<1x10xf32>
    %5 = vector.broadcast %4 : vector<1x10xf32> to vector<2x10xf32>
    %6 = arith.addf %3, %5 : vector<2x10xf32>
    %c0_5 = arith.constant 0 : index
    %c0_6 = arith.constant 0 : index
    %7 = vector.load %arg3[%c0_5, %c0_6] : memref<2x10xf32, #tpu.memory_space<vmem>>, vector<2x10xf32>
    tpu.vector_store %arg3[%c0_5, %c0_6], %6 {strides = array<i32>} : memref<2x10xf32, #tpu.memory_space<vmem>>, vector<2x10xf32>,
    return
  }
}

</mosaic_0001>

<bundles_post_ra>
// kernel: traced_net_forward.2
= control target key start
LH: loop header
LB: loop body
LE: loop exit
PB: predicated region body
PF: predicated region fallthrough
CT: control target
= control target key end

     0   :  { %s2683_s18 = smov 0   ;;  %s3558_s0 = inlined_call_operand.vmem [shape: f32[2,200,36], index: 0, kind: input, shape index: {}]   ;;  %s3559_s1 = inlined_call_operand.vmem [shape: f32[36,64], index: 1, kind: input, shape index: {}]   ;;  %s3560_s2 = inlined_call_operand.vmem [shape: f32[1,64], index: 2, kind: input, shape index: {}]   ;;  %s3561_s3 = inlined_call_operand.vmem [shape: f32[4,64,64], index: 3, kind: input, shape index: {}]   ;;  %s3562_s4 = inlined_call_operand.vmem [shape: f32[1,64], index: 4, kind: input, shape index: {}]   ;;  %s3563_s5 = inlined_call_operand.vmem [shape: f32[2,184,64], index: 5, kind: output, shape index: {}]  }
   0x1 LB: > { %s1883_s19 = sadd.s32 4294967295, %s2649_s18   ;;  %p1887_p0 = scmp.ge.s32.totalorder %s2649_s18, 1  ;;  %s2649_s18 = sphi %s2683_s18, %s15_s18  }
   0x2   : > { %p187_p1 = scmp.lt.s32.totalorder %s2649_s18, 3 }
   0x4   : > { %p188_p2 = pnand %p1887_p0, %p187_p1 }
   0x5   : > { %p215_p3 = scmp.lt.s32.totalorder (!%p188_p2), %s1883_s19, 1 }
   0x6   : > { %191 = sbr.rel (%p188_p2) target bundleno = 703 (0x2bf), region = 40 }
   0xb   : > { %v254_v0 = vld [vmem:[%s3559_s1 + $0x20] sm:$0xf]  ;;  %vm338_vm0 = vcmask 1043456   ;;  %v2651_v1 = vmov 0.0   ;;  %v253_v2 = vld [vmem:[%s3559_s1 + $0x18] sm:$0xff]  ;;  %vm2652_vm1 = vmmov 0  }
   0xc   : > { %2190 = vmatprep.subr.mxu0 %v2651_v1  ;;  %2615 = vmatprep.subr.mxu1 %v2651_v1  ;;  %v252_v3 = vld [vmem:[%s3559_s1 + $0x10] sm:$0xff]  ;;  %s3565_s19 = smov (!%p215_p3, %s1883_s19), 1  ;;  %v251_v4 = vld [vmem:[%s3559_s1 + $0x8] sm:$0xff]  ;;  %v250_v5 = vld [vmem:[%s3559_s1] sm:$0xff]  ;;  %vm262_vm2 = vcmask 293888   ;;  %vm557_vm3 = vcmask 523264  }
   0xd   : > { %2191 = vmatpush3.msk.msra.mxu0 %vm338_vm0, %v254_v0  ;;  %2200 = vmatprep.mubr.msk.f32.mxu0 %vm2652_vm1, %v2651_v1  ;;  %s2631_s28 = smul.u32 200, %s3565_s19  ;;  %v1924_v24 = vld [vmem:[%s3561_s3 + $0x78] sm:$0xff]  ;;  %v1923_v25 = vld [vmem:[%s3561_s3 + $0x70] sm:$0xff]  ;;  %v1922_v27 = vld [vmem:[%s3561_s3 + $0x68] sm:$0xff] }
   0xe   : > { %2192 = vmatprep.subr.mxu0 %v2651_v1  ;;  %2324 = vmatprep.mubr.msk.f32.mxu1 %vm2652_vm1, %v2651_v1  ;;  %v1921_v28 = vld [vmem:[%s3561_s3 + $0x60] sm:$0xff]  ;;  %v1920_v30 = vld [vmem:[%s3561_s3 + $0x58] sm:$0xff]  ;;  %v1919_v31 = vld [vmem:[%s3561_s3 + $0x50] sm:$0xff]  ;;  %s2632_s6 = smul.u32 184, %s3565_s19 }
   0xf   : > { %2193 = vmatpush3.msra.mxu0 %v253_v2  ;;  %s2721_s8 = scalar_lea.vmem %s3558_s0, %s2631_s28  ;;  %2623 = vmatpush3.msra.mxu1 %v1924_v24  ;;  %v1918_v33 = vld [vmem:[%s3561_s3 + $0x48] sm:$0xff]  ;;  %v1917_v34 = vld [vmem:[%s3561_s3 + $0x40] sm:$0xff]  ;;  %v1978_v56 = vld [vmem:[%s3561_s3 + $0xb8] sm:$0xff] }
  0x10   : > { %2194 = vmatprep.subr.mxu0 %v2651_v1  ;;  %v225_v6 = vld [vmem:[%s2721_s8] sm:$0xff]  ;;  %v226_v7 = vld [vmem:[%s2721_s8 + $0x8] sm:$0xff]  ;;  %v227_v8 = vld [vmem:[%s2721_s8 + $0x10] sm:$0xff]  ;;  %2616 = vmatprep.subr.mxu1 %v2651_v1  ;;  %s3463_s11 = scalar_lea.vmem %s3563_s5, %s2632_s6 }
  0x11   : > { %2195 = vmatpush3.msra.mxu0 %v252_v3  ;;  %v228_v9 = vld [vmem:[%s2721_s8 + $0x18] sm:$0xff]  ;;  %v229_v10 = vld [vmem:[%s2721_s8 + $0x20] sm:$0xff]  ;;  %v230_v11 = vld [vmem:[%s2721_s8 + $0x28] sm:$0xff]  ;;  %2624 = vmatpush3.msra.mxu1 %v1923_v25 }
  0x12   : > { %2196 = vmatprep.subr.mxu0 %v2651_v1  ;;  %v231_v12 = vld [vmem:[%s2721_s8 + $0x30] sm:$0xff]  ;;  %v232_v13 = vld [vmem:[%s2721_s8 + $0x38] sm:$0xff]  ;;  %v233_v14 = vld [vmem:[%s2721_s8 + $0x40] sm:$0xff]  ;;  %2617 = vmatprep.subr.mxu1 %v2651_v1 }
  0x13   : > { %2197 = vmatpush3.msra.mxu0 %v251_v4  ;;  %v234_v15 = vld [vmem:[%s2721_s8 + $0x48] sm:$0xff]  ;;  %v235_v16 = vld [vmem:[%s2721_s8 + $0x50] sm:$0xff]  ;;  %v236_v17 = vld [vmem:[%s2721_s8 + $0x58] sm:$0xff]  ;;  %2625 = vmatpush3.msra.mxu1 %v1922_v27 }
  0x14   : > { %2198 = vmatprep.subr.mxu0 %v2651_v1  ;;  %v237_v18 = vld [vmem:[%s2721_s8 + $0x60] sm:$0xff]  ;;  %v238_v19 = vld [vmem:[%s2721_s8 + $0x68] sm:$0xff]  ;;  %v239_v20 = vld [vmem:[%s2721_s8 + $0x70] sm:$0xff]  ;;  %2618 = vmatprep.subr.mxu1 %v2651_v1 }
  0x15   : > { %2199 = vmatpush3.msra.mxu0 %v250_v5  ;;  %v240_v21 = vld [vmem:[%s2721_s8 + $0x78] sm:$0xff]  ;;  %v241_v22 = vld [vmem:[%s2721_s8 + $0x80] sm:$0xff]  ;;  %v242_v23 = vld [vmem:[%s2721_s8 + $0x88] sm:$0xff]  ;;  %2626 = vmatpush3.msra.mxu1 %v1921_v28 }
  0x16   : > { %2201 = vmatmul.mubr.msk.f32.vlgmr.msra.gmra.mxu0 %vm262_vm2, %v225_v6  ;;  %2275 = vmatprep.subr.mxu0 %v2651_v1  ;;  %v243_v26 = vld [vmem:[%s2721_s8 + $0x90] sm:$0xff]  ;;  %v244_v29 = vld [vmem:[%s2721_s8 + $0x98] sm:$0xff]  ;;  %v245_v32 = vld [vmem:[%s2721_s8 + $0xa0] sm:$0xff] }
  0x17   : > { %2203 = vmatprep.mubr.msk.f32.mxu0 %vm2652_vm1, %v2651_v1  ;;  %2276 = vmatpush3.msra.mxu0 %v1924_v24  ;;  %v246_v35 = vld [vmem:[%s2721_s8 + $0xa8] sm:$0xff]  ;;  %v247_v36 = vld [vmem:[%s2721_s8 + $0xb0] sm:$0xff]  ;;  %v248_v37 = vld [vmem:[%s2721_s8 + $0xb8] sm:$0xff] }
  0x18   : > { %2277 = vmatprep.subr.mxu0 %v2651_v1  ;;  %2619 = vmatprep.subr.mxu1 %v2651_v1  ;;  %v249_v38 = vld [vmem:[%s2721_s8 + $0xc0] sm:$0xff]  ;;  %v1977_v60 = vld [vmem:[%s3561_s3 + $0xb0] sm:$0xff]  ;;  %v1976_v63 = vld [vmem:[%s3561_s3 + $0xa8] sm:$0xff] }
  0x19   : > { %2278 = vmatpush3.msra.mxu0 %v1923_v25  ;;  %2627 = vmatpush3.msra.mxu1 %v1920_v30  ;;  %v2868_v39 = vld [vmem:[%s3560_s2] ss:$0 sm:$0xff] }
  0x1a   : > { %2204 = vmatmul.mubr.msk.f32.gmra.mxu0 %vm262_vm2, %v226_v7  ;;  %2279 = vmatprep.subr.mxu0 %v2651_v1  ;;  %v1975_v4 = vld [vmem:[%s3561_s3 + $0xa0] sm:$0xff]  ;;  %v1974_v7 = vld [vmem:[%s3561_s3 + $0x98] sm:$0xff] }
  0x1b   : > { %2206 = vmatprep.mubr.msk.f32.mxu0 %vm2652_vm1, %v2651_v1  ;;  %2280 = vmatpush3.msra.mxu0 %v1922_v27 }
  0x1c   : > { %2281 = vmatprep.subr.mxu0 %v2651_v1  ;;  %2620 = vmatprep.subr.mxu1 %v2651_v1 }
  0x1d   : > { %2282 = vmatpush3.msra.mxu0 %v1921_v28  ;;  %2628 = vmatpush3.msra.mxu1 %v1919_v31 }
  0x1e   : > { %2207 = vmatmul.mubr.msk.f32.gmra.mxu0 %vm262_vm2, %v227_v8  ;;  %2283 = vmatprep.subr.mxu0 %v2651_v1 }
  0x1f   : > { %2209 = vmatprep.mubr.msk.f32.mxu0 %vm2652_vm1, %v2651_v1  ;;  %2284 = vmatpush3.msra.mxu0 %v1920_v30 }
  0x20   : > { %2285 = vmatprep.subr.mxu0 %v2651_v1  ;;  %2621 = vmatprep.subr.mxu1 %v2651_v1 }
  0x21   : > { %2286 = vmatpush3.msra.mxu0 %v1919_v31  ;;  %2629 = vmatpush3.msra.mxu1 %v1918_v33 }
  0x22   : > { %2210 = vmatmul.mubr.msk.f32.gmra.mxu0 %vm262_vm2, %v228_v9  ;;  %2287 = vmatprep.subr.mxu0 %v2651_v1 }
  0x23   : > { %2212 = vmatprep.mubr.msk.f32.mxu0 %vm2652_vm1, %v2651_v1  ;;  %2288 = vmatpush3.msra.mxu0 %v1918_v33 }
  0x24   : > { %2289 = vmatprep.subr.mxu0 %v2651_v1  ;;  %2622 = vmatprep.subr.mxu1 %v2651_v1 }
  0x25   : > { %2290 = vmatpush3.msra.mxu0 %v1917_v34  ;;  %2630 = vmatpush3.msra.mxu1 %v1917_v34 }
  0x26   : > { %2213 = vmatmul.mubr.msk.f32.gmra.mxu0 %vm262_vm2, %v229_v10  ;;  %2445 = vmatprep.subr.mxu0 %v2651_v1 }
  0x27   : > { %2215 = vmatprep.mubr.msk.f32.mxu0 %vm2652_vm1, %v2651_v1  ;;  %2360 = vmatprep.subr.mxu1 %v2651_v1 }
  0x2a   : > { %2216 = vmatmul.mubr.msk.f32.gmra.mxu0 %vm262_vm2, %v230_v11  ;;  %v1973_v11 = vld [vmem:[%s3561_s3 + $0x90] sm:$0xff] }
  0x2b   : > { %2218 = vmatprep.mubr.msk.f32.mxu0 %vm2652_vm1, %v2651_v1 }
  0x2e   : > { %2219 = vmatmul.mubr.msk.f32.gmra.mxu0 %vm262_vm2, %v231_v12 }
  0x2f   : > { %2221 = vmatprep.mubr.msk.f32.mxu0 %vm2652_vm1, %v2651_v1 }
  0x32   : > { %2222 = vmatmul.mubr.msk.f32.gmra.mxu0 %vm262_vm2, %v232_v13 }
  0x33   : > { %2224 = vmatprep.mubr.msk.f32.mxu0 %vm2652_vm1, %v2651_v1 }
  0x36   : > { %2225 = vmatmul.mubr.msk.f32.gmra.mxu0 %vm262_vm2, %v233_v14  ;;  %v1972_v14 = vld [vmem:[%s3561_s3 + $0x88] sm:$0xff] }
  0x37   : > { %2227 = vmatprep.mubr.msk.f32.mxu0 %vm2652_vm1, %v2651_v1 }
  0x3a   : > { %2228 = vmatmul.mubr.msk.f32.gmra.mxu0 %vm262_vm2, %v234_v15 }
  0x3b   : > { %2230 = vmatprep.mubr.msk.f32.mxu0 %vm2652_vm1, %v2651_v1 }
  0x3e   : > { %2231 = vmatmul.mubr.msk.f32.gmra.mxu0 %vm262_vm2, %v235_v16 }
  0x3f   : > { %2233 = vmatprep.mubr.msk.f32.mxu0 %vm2652_vm1, %v2651_v1 }
  0x42   : > { %2234 = vmatmul.mubr.msk.f32.gmra.mxu0 %vm262_vm2, %v236_v17 }
  0x43   : > { %2236 = vmatprep.mubr.msk.f32.mxu0 %vm2652_vm1, %v2651_v1 }
  0x46   : > { %2237 = vmatmul.mubr.msk.f32.gmra.mxu0 %vm262_vm2, %v237_v18  ;;  %v1971_v18 = vld [vmem:[%s3561_s3 + $0x80] sm:$0xff] }
  0x47   : > { %2239 = vmatprep.mubr.msk.f32.mxu0 %vm2652_vm1, %v2651_v1 }
  0x4a   : > { %2240 = vmatmul.mubr.msk.f32.gmra.mxu0 %vm262_vm2, %v238_v19 }
  0x4b   : > { %2242 = vmatprep.mubr.msk.f32.mxu0 %vm2652_vm1, %v2651_v1 }
  0x4e   : > { %2243 = vmatmul.mubr.msk.f32.gmra.mxu0 %vm262_vm2, %v239_v20 }
  0x4f   : > { %2245 = vmatprep.mubr.msk.f32.mxu0 %vm2652_vm1, %v2651_v1 }
  0x52   : > { %2246 = vmatmul.mubr.msk.f32.gmra.mxu0 %vm262_vm2, %v240_v21 }
  0x53   : > { %2248 = vmatprep.mubr.msk.f32.mxu0 %vm2652_vm1, %v2651_v1 }
  0x56   : > { %2249 = vmatmul.mubr.msk.f32.gmra.mxu0 %vm262_vm2, %v241_v22 }
  0x57   : > { %2251 = vmatprep.mubr.msk.f32.mxu0 %vm2652_vm1, %v2651_v1 }
  0x5a   : > { %2252 = vmatmul.mubr.msk.f32.gmra.mxu0 %vm262_vm2, %v242_v23 }
  0x5b   : > { %2254 = vmatprep.mubr.msk.f32.mxu0 %vm2652_vm1, %v2651_v1 }
  0x5e   : > { %2255 = vmatmul.mubr.msk.f32.gmra.mxu0 %vm262_vm2, %v243_v26 }
  0x5f   : > { %2257 = vmatprep.mubr.msk.f32.mxu0 %vm2652_vm1, %v2651_v1 }
  0x62   : > { %2258 = vmatmul.mubr.msk.f32.gmra.mxu0 %vm262_vm2, %v244_v29 }
  0x63   : > { %2260 = vmatprep.mubr.msk.f32.mxu0 %vm2652_vm1, %v2651_v1 }
  0x66   : > { %2261 = vmatmul.mubr.msk.f32.gmra.mxu0 %vm262_vm2, %v245_v32 }
  0x67   : > { %2263 = vmatprep.mubr.msk.f32.mxu0 %vm2652_vm1, %v2651_v1 }
  0x6a   : > { %2264 = vmatmul.mubr.msk.f32.gmra.mxu0 %vm262_vm2, %v246_v35 }
  0x6b   : > { %2266 = vmatprep.mubr.msk.f32.mxu0 %vm2652_vm1, %v2651_v1 }
  0x6e   : > { %2267 = vmatmul.mubr.msk.f32.gmra.mxu0 %vm262_vm2, %v247_v36 }
  0x6f   : > { %2269 = vmatprep.mubr.msk.f32.mxu0 %vm2652_vm1, %v2651_v1 }
  0x72   : > { %2270 = vmatmul.mubr.msk.f32.gmra.mxu0 %vm262_vm2, %v248_v37 }
  0x73   : > { %2272 = vmatprep.mubr.msk.f32.mxu0 %vm2652_vm1, %v2651_v1 }
  0x76   : > { %2273 = vmatmul.mubr.msk.f32.gmra.mxu0 %vm262_vm2, %v249_v38 }
  0x77   : > { %2291 = vmatprep.mubr.msk.f32.mxu0 %vm2652_vm1, %v2651_v1 }
  0xd6   : > { %v408_v40 = vpop.f32.mrf.mxu0 }
  0xd7   : > { %v409_v41 = vadd.f32 %v2868_v39, %v408_v40 }
  0xd8   : > { %v2202_v42 = vpop.f32.mrf.mxu0 }
  0xd9   : > { %v532_v43 = vmax.f32 %v409_v41, 0.0 }
  0xda   : > { %v413_v44 = vpop.f32.mrf.mxu0 }
  0xdb   : > { %558 = vst.msk [vmem:[#allocation2] sm:$0xff] %vm557_vm3, %v532_v43  ;;  %v414_v45 = vadd.f32 %v2868_v39, %v413_v44 }
  0xdc   : > { %v2205_v46 = vpop.f32.mrf.mxu0 }
  0xdd   : > { %v533_v47 = vmax.f32 %v414_v45, 0.0 }
  0xde   : > { %v418_v48 = vpop.f32.mrf.mxu0 }
  0xdf   : > { %559 = vst.msk [vmem:[#allocation2 + $0x8] sm:$0xff] %vm557_vm3, %v533_v47  ;;  %v419_v49 = vadd.f32 %v2868_v39, %v418_v48 }
  0xe0   : > { %v2208_v50 = vpop.f32.mrf.mxu0 }
  0xe1   : > { %v534_v51 = vmax.f32 %v419_v49, 0.0 }
  0xe2   : > { %v423_v52 = vpop.f32.mrf.mxu0 }
  0xe3   : > { %560 = vst.msk [vmem:[#allocation2 + $0x10] sm:$0xff] %vm557_vm3, %v534_v51  ;;  %v424_v53 = vadd.f32 %v2868_v39, %v423_v52 }
  0xe4   : > { %v2211_v54 = vpop.f32.mrf.mxu0 }
  0xe5   : > { %v535_v55 = vmax.f32 %v424_v53, 0.0 }
  0xe6   : > { %v428_v57 = vpop.f32.mrf.mxu0  ;;  %v614_v58 = vld [vmem:[#allocation2 + $0x1] sm:$0xff] }
  0xe7   : > { %561 = vst.msk [vmem:[#allocation2 + $0x18] sm:$0xff] %vm557_vm3, %v535_v55  ;;  %v429_v59 = vadd.f32 %v2868_v39, %v428_v57  ;;  %2292 = vmatmul.mubr.msk.f32.vlgmr.msra.gmra.mxu0 %vm557_vm3, %v614_v58  ;;  %v613_v57 = vld [vmem:[%s3561_s3 + $0x38] sm:$0xff] }
  0xe8   : > { %v2214_v61 = vpop.f32.mrf.mxu0  ;;  %2294 = vmatprep.mubr.msk.f32.mxu0 %vm2652_vm1, %v2651_v1  ;;  %2446 = vmatpush3.msra.mxu0 %v1978_v56 }
  0xe9   : > { %v536_v62 = vmax.f32 %v429_v59, 0.0  ;;  %2447 = vmatprep.subr.mxu0 %v2651_v1 }
  0xea   : > { %v433_v0 = vpop.f32.mrf.mxu0  ;;  %v615_v2 = vld [vmem:[#allocation2 + $0x9] sm:$0xff]  ;;  %2448 = vmatpush3.msra.mxu0 %v1977_v60 }
  0xeb   : > { %562 = vst.msk [vmem:[#allocation2 + $0x20] sm:$0xff] %vm557_vm3, %v536_v62  ;;  %v434_v3 = vadd.f32 %v2868_v39, %v433_v0  ;;  %2295 = vmatmul.mubr.msk.f32.gmra.mxu0 %vm557_vm3, %v615_v2  ;;  %2449 = vmatprep.subr.mxu0 %v2651_v1  ;;  %v1144_v60 = vld [vmem:[#allocation2 + $0xe] sm:$0xff] }
  0xec   : > { %v2217_v5 = vpop.f32.mrf.mxu0  ;;  %2297 = vmatprep.mubr.msk.f32.mxu0 %vm2652_vm1, %v2651_v1  ;;  %2450 = vmatpush3.msra.mxu0 %v1976_v63  ;;  %v612_v62 = vld [vmem:[%s3561_s3 + $0x30] sm:$0xff] }
  0xed   : > { %v537_v6 = vmax.f32 %v434_v3, 0.0  ;;  %2451 = vmatprep.subr.mxu0 %v2651_v1 }
  0xee   : > { %v438_v8 = vpop.f32.mrf.mxu0  ;;  %v616_v9 = vld [vmem:[#allocation2 + $0x11] sm:$0xff]  ;;  %2452 = vmatpush3.msra.mxu0 %v1975_v4 }
  0xef   : > { %563 = vst.msk [vmem:[#allocation2 + $0x28] sm:$0xff] %vm557_vm3, %v537_v6  ;;  %v439_v10 = vadd.f32 %v2868_v39, %v438_v8  ;;  %2298 = vmatmul.mubr.msk.f32.gmra.mxu0 %vm557_vm3, %v616_v9  ;;  %2453 = vmatprep.subr.mxu0 %v2651_v1  ;;  %v1145_v4 = vld [vmem:[#allocation2 + $0x16] sm:$0xff]  ;;  %v611_v6 = vld [vmem:[%s3561_s3 + $0x28] sm:$0xff] }
  0xf0   : > { %v2220_v12 = vpop.f32.mrf.mxu0  ;;  %2300 = vmatprep.mubr.msk.f32.mxu0 %vm2652_vm1, %v2651_v1  ;;  %2454 = vmatpush3.msra.mxu0 %v1974_v7 }
  0xf1   : > { %v538_v13 = vmax.f32 %v439_v10, 0.0  ;;  %2455 = vmatprep.subr.mxu0 %v2651_v1 }
  0xf2   : > { %v443_v15 = vpop.f32.mrf.mxu0  ;;  %v617_v16 = vld [vmem:[#allocation2 + $0x19] sm:$0xff]  ;;  %2456 = vmatpush3.msra.mxu0 %v1973_v11 }
  0xf3   : > { %564 = vst.msk [vmem:[#allocation2 + $0x30] sm:$0xff] %vm557_vm3, %v538_v13  ;;  %v444_v17 = vadd.f32 %v2868_v39, %v443_v15  ;;  %2301 = vmatmul.mubr.msk.f32.gmra.mxu0 %vm557_vm3, %v617_v16  ;;  %2457 = vmatprep.subr.mxu0 %v2651_v1  ;;  %v1146_v11 = vld [vmem:[#allocation2 + $0x1e] sm:$0xff] }
  0xf4   : > { %v2223_v19 = vpop.f32.mrf.mxu0  ;;  %2303 = vmatprep.mubr.msk.f32.mxu0 %vm2652_vm1, %v2651_v1  ;;  %2458 = vmatpush3.msra.mxu0 %v1972_v14  ;;  %v610_v13 = vld [vmem:[%s3561_s3 + $0x20] sm:$0xff] }
  0xf5   : > { %v539_v20 = vmax.f32 %v444_v17, 0.0  ;;  %2459 = vmatprep.subr.mxu0 %v2651_v1 }
  0xf6   : > { %v448_v21 = vpop.f32.mrf.mxu0  ;;  %v618_v22 = vld [vmem:[#allocation2 + $0x21] sm:$0xff]  ;;  %2460 = vmatpush3.msra.mxu0 %v1971_v18 }
  0xf7   : > { %565 = vst.msk [vmem:[#allocation2 + $0x38] sm:$0xff] %vm557_vm3, %v539_v20  ;;  %v449_v23 = vadd.f32 %v2868_v39, %v448_v21  ;;  %2304 = vmatmul.mubr.msk.f32.gmra.mxu0 %vm557_vm3, %v618_v22  ;;  %v1147_v18 = vld [vmem:[#allocation2 + $0x26] sm:$0xff]  ;;  %v609_v20 = vld [vmem:[%s3561_s3 + $0x18] sm:$0xff] }
  0xf8   : > { %v2226_v24 = vpop.f32.mrf.mxu0  ;;  %2306 = vmatprep.mubr.msk.f32.mxu0 %vm2652_vm1, %v2651_v1 }
  0xf9   : > { %v540_v25 = vmax.f32 %v449_v23, 0.0 }
  0xfa   : > { %v453_v26 = vpop.f32.mrf.mxu0  ;;  %v619_v27 = vld [vmem:[#allocation2 + $0x29] sm:$0xff] }
  0xfb   : > { %566 = vst.msk [vmem:[#allocation2 + $0x40] sm:$0xff] %vm557_vm3, %v540_v25  ;;  %v454_v28 = vadd.f32 %v2868_v39, %v453_v26  ;;  %2307 = vmatmul.mubr.msk.f32.gmra.mxu0 %vm557_vm3, %v619_v27  ;;  %v1148_v25 = vld [vmem:[#allocation2 + $0x2e] sm:$0xff] }
  0xfc   : > { %v2229_v29 = vpop.f32.mrf.mxu0  ;;  %2309 = vmatprep.mubr.msk.f32.mxu0 %vm2652_vm1, %v2651_v1  ;;  %v608_v27 = vld [vmem:[%s3561_s3 + $0x10] sm:$0xff] }
  0xfd   : > { %v541_v30 = vmax.f32 %v454_v28, 0.0 }
  0xfe   : > { %v458_v31 = vpop.f32.mrf.mxu0  ;;  %v620_v32 = vld [vmem:[#allocation2 + $0x31] sm:$0xff] }
  0xff   : > { %567 = vst.msk [vmem:[#allocation2 + $0x48] sm:$0xff] %vm557_vm3, %v541_v30  ;;  %v459_v33 = vadd.f32 %v2868_v39, %v458_v31  ;;  %2310 = vmatmul.mubr.msk.f32.gmra.mxu0 %vm557_vm3, %v620_v32  ;;  %v1149_v32 = vld [vmem:[#allocation2 + $0x36] sm:$0xff] }
 0x100   : > { %v2232_v34 = vpop.f32.mrf.mxu0  ;;  %2312 = vmatprep.mubr.msk.f32.mxu0 %vm2652_vm1, %v2651_v1 }
 0x101   : > { %v542_v35 = vmax.f32 %v459_v33, 0.0  ;;  %v607_v34 = vld [vmem:[%s3561_s3 + $0x8] sm:$0xff] }
 0x102   : > { %v463_v36 = vpop.f32.mrf.mxu0  ;;  %v621_v37 = vld [vmem:[#allocation2 + $0x39] sm:$0xff] }
 0x103   : > { %568 = vst.msk [vmem:[#allocation2 + $0x50] sm:$0xff] %vm557_vm3, %v542_v35  ;;  %v464_v38 = vadd.f32 %v2868_v39, %v463_v36  ;;  %2313 = vmatmul.mubr.msk.f32.gmra.mxu0 %vm557_vm3, %v621_v37 }
 0x104   : > { %v2235_v40 = vpop.f32.mrf.mxu0  ;;  %2315 = vmatprep.mubr.msk.f32.mxu0 %vm2652_vm1, %v2651_v1 }
 0x105   : > { %v543_v41 = vmax.f32 %v464_v38, 0.0  ;;  %v1150_v40 = vld [vmem:[#allocation2 + $0x3e] sm:$0xff] }
 0x106   : > { %v468_v42 = vpop.f32.mrf.mxu0  ;;  %v622_v43 = vld [vmem:[#allocation2 + $0x41] sm:$0xff] }
 0x107   : > { %569 = vst.msk [vmem:[#allocation2 + $0x58] sm:$0xff] %vm557_vm3, %v543_v41  ;;  %v469_v44 = vadd.f32 %v2868_v39, %v468_v42  ;;  %2316 = vmatmul.mubr.msk.f32.gmra.mxu0 %vm557_vm3, %v622_v43  ;;  %v606_v42 = vld [vmem:[%s3561_s3] sm:$0xff] }
 0x108   : > { %v2238_v45 = vpop.f32.mrf.mxu0  ;;  %2318 = vmatprep.mubr.msk.f32.mxu0 %vm2652_vm1, %v2651_v1 }
 0x109   : > { %v544_v46 = vmax.f32 %v469_v44, 0.0 }
 0x10a   : > { %v473_v47 = vpop.f32.mrf.mxu0  ;;  %v623_v48 = vld [vmem:[#allocation2 + $0x49] sm:$0xff] }
 0x10b   : > { %570 = vst.msk [vmem:[#allocation2 + $0x60] sm:$0xff] %vm557_vm3, %v544_v46  ;;  %v474_v49 = vadd.f32 %v2868_v39, %v473_v47  ;;  %2319 = vmatmul.mubr.msk.f32.gmra.mxu0 %vm557_vm3, %v623_v48  ;;  %v1151_v47 = vld [vmem:[#allocation2 + $0x46] sm:$0xff] }
 0x10c   : > { %v2241_v50 = vpop.f32.mrf.mxu0  ;;  %2321 = vmatprep.mubr.msk.f32.mxu0 %vm2652_vm1, %v2651_v1 }
 0x10d   : > { %v545_v51 = vmax.f32 %v474_v49, 0.0 }
 0x10e   : > { %v478_v52 = vpop.f32.mrf.mxu0  ;;  %v624_v53 = vld [vmem:[#allocation2 + $0x51] sm:$0xff] }
 0x10f   : > { %571 = vst.msk [vmem:[#allocation2 + $0x68] sm:$0xff] %vm557_vm3, %v545_v51  ;;  %v479_v54 = vadd.f32 %v2868_v39, %v478_v52  ;;  %2322 = vmatmul.mubr.msk.f32.gmra.mxu0 %vm557_vm3, %v624_v53  ;;  %v1152_v53 = vld [vmem:[#allocation2 + $0x4e] sm:$0xff] }
 0x110   : > { %v2244_v55 = vpop.f32.mrf.mxu0  ;;  %2461 = vmatprep.mubr.msk.f32.mxu0 %vm2652_vm1, %v2651_v1 }
 0x111   : > { %v546_v56 = vmax.f32 %v479_v54, 0.0 }
 0x112   : > { %v483_v58 = vpop.f32.mrf.mxu0  ;;  %v625_v59 = vld [vmem:[#allocation2 + $0x59] sm:$0xff] }
 0x113   : > { %572 = vst.msk [vmem:[#allocation2 + $0x70] sm:$0xff] %vm557_vm3, %v546_v56  ;;  %v484_v61 = vadd.f32 %v2868_v39, %v483_v58  ;;  %2325 = vmatmul.mubr.msk.f32.vlgmr.msra.gmra.mxu1 %vm557_vm3, %v625_v59  ;;  %2462 = vmatmul.mubr.msk.f32.vlgmr.msra.gmra.mxu0 %vm557_vm3, %v1144_v60  ;;  %v1153_v59 = vld [vmem:[#allocation2 + $0x56] sm:$0xff] }
 0x114   : > { %2361 = vmatpush3.msra.mxu1 %v613_v57  ;;  %v2247_v63 = vpop.f32.mrf.mxu0  ;;  %2327 = vmatprep.mubr.msk.f32.mxu1 %vm2652_vm1, %v2651_v1 }
 0x115   : > { %v547_v0 = vmax.f32 %v484_v61, 0.0  ;;  %2464 = vmatprep.mubr.msk.f32.mxu0 %vm2652_vm1, %v2651_v1  ;;  %2362 = vmatprep.subr.mxu1 %v2651_v1 }
 0x116   : > { %v488_v2 = vpop.f32.mrf.mxu0  ;;  %v626_v3 = vld [vmem:[#allocation2 + $0x61] sm:$0xff]  ;;  %2363 = vmatpush3.msra.mxu1 %v612_v62 }
 0x117   : > { %573 = vst.msk [vmem:[#allocation2 + $0x78] sm:$0xff] %vm557_vm3, %v547_v0  ;;  %v489_v5 = vadd.f32 %v2868_v39, %v488_v2  ;;  %2328 = vmatmul.mubr.msk.f32.gmra.mxu1 %vm557_vm3, %v626_v3  ;;  %2465 = vmatmul.mubr.msk.f32.gmra.mxu0 %vm557_vm3, %v1145_v4  ;;  %v1154_v0 = vld [vmem:[#allocation2 + $0x5e] sm:$0xff]  ;;  %v1155_v2 = vld [vmem:[#allocation2 + $0x66] sm:$0xff] }
 0x118   : > { %v2250_v7 = vpop.f32.mrf.mxu0  ;;  %2330 = vmatprep.mubr.msk.f32.mxu1 %vm2652_vm1, %v2651_v1  ;;  %2467 = vmatprep.mubr.msk.f32.mxu0 %vm2652_vm1, %v2651_v1  ;;  %v2009_v3 = vld [vmem:[%s3561_s3 + $0xf8] sm:$0xff]  ;;  %v583_v4 = vld [vmem:[#allocation2] sm:$0xff] }
 0x119   : > { %v548_v8 = vmax.f32 %v489_v5, 0.0  ;;  %2364 = vmatprep.subr.mxu1 %v2651_v1  ;;  %v584_v7 = vld [vmem:[#allocation2 + $0x8] sm:$0xff] }
 0x11a   : > { %v493_v9 = vpop.f32.mrf.mxu0  ;;  %v627_v10 = vld [vmem:[#allocation2 + $0x69] sm:$0xff]  ;;  %2365 = vmatpush3.msra.mxu1 %v611_v6 }
 0x11b   : > { %574 = vst.msk [vmem:[#allocation2 + $0x80] sm:$0xff] %vm557_vm3, %v548_v8  ;;  %v494_v12 = vadd.f32 %v2868_v39, %v493_v9  ;;  %2331 = vmatmul.mubr.msk.f32.gmra.mxu1 %vm557_vm3, %v627_v10  ;;  %2468 = vmatmul.mubr.msk.f32.gmra.mxu0 %vm557_vm3, %v1146_v11  ;;  %v1156_v5 = vld [vmem:[#allocation2 + $0x6e] sm:$0xff] }
 0x11c   : > { %v2253_v14 = vpop.f32.mrf.mxu0  ;;  %2333 = vmatprep.mubr.msk.f32.mxu1 %vm2652_vm1, %v2651_v1  ;;  %2470 = vmatprep.mubr.msk.f32.mxu0 %vm2652_vm1, %v2651_v1  ;;  %v2008_v6 = vld [vmem:[%s3561_s3 + $0xf0] sm:$0xff]  ;;  %v2007_v9 = vld [vmem:[%s3561_s3 + $0xe8] sm:$0xff] }
 0x11d   : > { %v549_v15 = vmax.f32 %v494_v12, 0.0  ;;  %2366 = vmatprep.subr.mxu1 %v2651_v1  ;;  %v585_v10 = vld [vmem:[#allocation2 + $0x10] sm:$0xff]  ;;  %v2006_v12 = vld [vmem:[%s3561_s3 + $0xe0] sm:$0xff] }
 0x11e   : > { %v498_v16 = vpop.f32.mrf.mxu0  ;;  %v628_v17 = vld [vmem:[#allocation2 + $0x71] sm:$0xff]  ;;  %2367 = vmatpush3.msra.mxu1 %v610_v13 }
 0x11f   : > { %575 = vst.msk [vmem:[#allocation2 + $0x88] sm:$0xff] %vm557_vm3, %v549_v15  ;;  %v499_v19 = vadd.f32 %v2868_v39, %v498_v16  ;;  %2334 = vmatmul.mubr.msk.f32.gmra.mxu1 %vm557_vm3, %v628_v17  ;;  %2471 = vmatmul.mubr.msk.f32.gmra.mxu0 %vm557_vm3, %v1147_v18  ;;  %v1157_v8 = vld [vmem:[#allocation2 + $0x76] sm:$0xff]  ;;  %v587_v16 = vld [vmem:[#allocation2 + $0x20] sm:$0xff] }
 0x120   : > { %v2256_v21 = vpop.f32.mrf.mxu0  ;;  %2336 = vmatprep.mubr.msk.f32.mxu1 %vm2652_vm1, %v2651_v1  ;;  %2473 = vmatprep.mubr.msk.f32.mxu0 %vm2652_vm1, %v2651_v1  ;;  %v586_v13 = vld [vmem:[#allocation2 + $0x18] sm:$0xff]  ;;  %v2004_v18 = vld [vmem:[%s3561_s3 + $0xd0] sm:$0xff] }
 0x121   : > { %v550_v22 = vmax.f32 %v499_v19, 0.0  ;;  %2368 = vmatprep.subr.mxu1 %v2651_v1  ;;  %v2005_v15 = vld [vmem:[%s3561_s3 + $0xd8] sm:$0xff]  ;;  %v588_v19 = vld [vmem:[#allocation2 + $0x28] sm:$0xff] }
 0x122   : > { %v503_v23 = vpop.f32.mrf.mxu0  ;;  %v629_v24 = vld [vmem:[#allocation2 + $0x79] sm:$0xff]  ;;  %2369 = vmatpush3.msra.mxu1 %v609_v20  ;;  %v2003_v21 = vld [vmem:[%s3561_s3 + $0xc8] sm:$0xff] }
 0x123   : > { %576 = vst.msk [vmem:[#allocation2 + $0x90] sm:$0xff] %vm557_vm3, %v550_v22  ;;  %v504_v26 = vadd.f32 %v2868_v39, %v503_v23  ;;  %2337 = vmatmul.mubr.msk.f32.gmra.mxu1 %vm557_vm3, %v629_v24  ;;  %2474 = vmatmul.mubr.msk.f32.gmra.mxu0 %vm557_vm3, %v1148_v25  ;;  %v1158_v11 = vld [vmem:[#allocation2 + $0x7e] sm:$0xff]  ;;  %v589_v22 = vld [vmem:[#allocation2 + $0x30] sm:$0xff] }
 0x124   : > { %v2259_v28 = vpop.f32.mrf.mxu0  ;;  %2339 = vmatprep.mubr.msk.f32.mxu1 %vm2652_vm1, %v2651_v1  ;;  %2476 = vmatprep.mubr.msk.f32.mxu0 %vm2652_vm1, %v2651_v1  ;;  %v2002_v24 = vld [vmem:[%s3561_s3 + $0xc0] sm:$0xff]  ;;  %v590_v25 = vld [vmem:[#allocation2 + $0x38] sm:$0xff] }
 0x125   : > { %v551_v29 = vmax.f32 %v504_v26, 0.0  ;;  %2370 = vmatprep.subr.mxu1 %v2651_v1 }
 0x126   : > { %v508_v30 = vpop.f32.mrf.mxu0  ;;  %v630_v31 = vld [vmem:[#allocation2 + $0x81] sm:$0xff]  ;;  %2371 = vmatpush3.msra.mxu1 %v608_v27 }
 0x127   : > { %577 = vst.msk [vmem:[#allocation2 + $0x98] sm:$0xff] %vm557_vm3, %v551_v29  ;;  %v509_v33 = vadd.f32 %v2868_v39, %v508_v30  ;;  %2340 = vmatmul.mubr.msk.f32.gmra.mxu1 %vm557_vm3, %v630_v31  ;;  %2477 = vmatmul.mubr.msk.f32.gmra.mxu0 %vm557_vm3, %v1149_v32  ;;  %v1159_v14 = vld [vmem:[#allocation2 + $0x86] sm:$0xff]  ;;  %v593_v31 = vld [vmem:[#allocation2 + $0x50] sm:$0xff] }
 0x128   : > { %v2262_v35 = vpop.f32.mrf.mxu0  ;;  %2342 = vmatprep.mubr.msk.f32.mxu1 %vm2652_vm1, %v2651_v1  ;;  %2479 = vmatprep.mubr.msk.f32.mxu0 %vm2652_vm1, %v2651_v1  ;;  %v591_v27 = vld [vmem:[#allocation2 + $0x40] sm:$0xff]  ;;  %v592_v29 = vld [vmem:[#allocation2 + $0x48] sm:$0xff] }
 0x129   : > { %v552_v36 = vmax.f32 %v509_v33, 0.0  ;;  %2372 = vmatprep.subr.mxu1 %v2651_v1  ;;  %v594_v33 = vld [vmem:[#allocation2 + $0x58] sm:$0xff]  ;;  %v596_v35 = vld [vmem:[#allocation2 + $0x68] sm:$0xff] }
 0x12a   : > { %v513_v37 = vpop.f32.mrf.mxu0  ;;  %v631_v38 = vld [vmem:[#allocation2 + $0x89] sm:$0xff]  ;;  %2373 = vmatpush3.msra.mxu1 %v607_v34  ;;  %v595_v34 = vld [vmem:[#allocation2 + $0x60] sm:$0xff] }
 0x12b   : > { %578 = vst.msk [vmem:[#allocation2 + $0xa0] sm:$0xff] %vm557_vm3, %v552_v36  ;;  %v514_v41 = vadd.f32 %v2868_v39, %v513_v37  ;;  %2343 = vmatmul.mubr.msk.f32.gmra.mxu1 %vm557_vm3, %v631_v38  ;;  %2480 = vmatmul.mubr.msk.f32.gmra.mxu0 %vm557_vm3, %v1150_v40  ;;  %v1160_v17 = vld [vmem:[#allocation2 + $0x8e] sm:$0xff]  ;;  %v598_v37 = vld [vmem:[#allocation2 + $0x78] sm:$0xff]  ;;  %v599_v38 = vld [vmem:[#allocation2 + $0x80] sm:$0xff] }
 0x12c   : > { %v2265_v43 = vpop.f32.mrf.mxu0  ;;  %2345 = vmatprep.mubr.msk.f32.mxu1 %vm2652_vm1, %v2651_v1  ;;  %2482 = vmatprep.mubr.msk.f32.mxu0 %vm2652_vm1, %v2651_v1  ;;  %v597_v36 = vld [vmem:[#allocation2 + $0x70] sm:$0xff]  ;;  %v600_v40 = vld [vmem:[#allocation2 + $0x88] sm:$0xff] }
 0x12d   : > { %v553_v44 = vmax.f32 %v514_v41, 0.0  ;;  %2374 = vmatprep.subr.mxu1 %v2651_v1  ;;  %v601_v41 = vld [vmem:[#allocation2 + $0x90] sm:$0xff] }
 0x12e   : > { %v518_v45 = vpop.f32.mrf.mxu0  ;;  %v632_v46 = vld [vmem:[#allocation2 + $0x91] sm:$0xff]  ;;  %2375 = vmatpush3.msra.mxu1 %v606_v42 }
 0x12f   : > { %579 = vst.msk [vmem:[#allocation2 + $0xa8] sm:$0xff] %vm557_vm3, %v553_v44  ;;  %v519_v48 = vadd.f32 %v2868_v39, %v518_v45  ;;  %2346 = vmatmul.mubr.msk.f32.gmra.mxu1 %vm557_vm3, %v632_v46  ;;  %2483 = vmatmul.mubr.msk.f32.gmra.mxu0 %vm557_vm3, %v1151_v47  ;;  %v1161_v20 = vld [vmem:[#allocation2 + $0x96] sm:$0xff] }
 0x130   : > { %v2268_v49 = vpop.f32.mrf.mxu0  ;;  %2348 = vmatprep.mubr.msk.f32.mxu1 %vm2652_vm1, %v2651_v1  ;;  %2485 = vmatprep.mubr.msk.f32.mxu0 %vm2652_vm1, %v2651_v1  ;;  %v602_v42 = vld [vmem:[#allocation2 + $0x98] sm:$0xff]  ;;  %v1448_v46 = vld [vmem:[#allocation2 + $0xf] sm:$0xff] }
 0x131   : > { %v554_v50 = vmax.f32 %v519_v48, 0.0  ;;  %2530 = vmatprep.subr.mxu1 %v2651_v1  ;;  %v1449_v47 = vld [vmem:[#allocation2 + $0x17] sm:$0xff]  ;;  %v1450_v48 = vld [vmem:[#allocation2 + $0x1f] sm:$0xff] }
 0x132   : > { %v523_v51 = vpop.f32.mrf.mxu0  ;;  %v633_v52 = vld [vmem:[#allocation2 + $0x99] sm:$0xff] }
 0x133   : > { %580 = vst.msk [vmem:[#allocation2 + $0xb0] sm:$0xff] %vm557_vm3, %v554_v50  ;;  %v524_v54 = vadd.f32 %v2868_v39, %v523_v51  ;;  %2349 = vmatmul.mubr.msk.f32.gmra.mxu1 %vm557_vm3, %v633_v52  ;;  %2486 = vmatmul.mubr.msk.f32.gmra.mxu0 %vm557_vm3, %v1152_v53  ;;  %v1162_v23 = vld [vmem:[#allocation2 + $0x9e] sm:$0xff]  ;;  %v1451_v51 = vld [vmem:[#allocation2 + $0x27] sm:$0xff] }
 0x134   : > { %v2271_v55 = vpop.f32.mrf.mxu0  ;;  %2351 = vmatprep.mubr.msk.f32.mxu1 %vm2652_vm1, %v2651_v1  ;;  %2488 = vmatprep.mubr.msk.f32.mxu0 %vm2652_vm1, %v2651_v1  ;;  %v603_v43 = vld [vmem:[#allocation2 + $0xa0] sm:$0xff] }
 0x135   : > { %v555_v56 = vmax.f32 %v524_v54, 0.0  ;;  %v1452_v54 = vld [vmem:[#allocation2 + $0x2f] sm:$0xff] }
 0x136   : > { %v528_v57 = vpop.f32.mrf.mxu0  ;;  %v634_v58 = vld [vmem:[#allocation2 + $0xa1] sm:$0xff] }
 0x137   : > { %581 = vst.msk [vmem:[#allocation2 + $0xb8] sm:$0xff] %vm557_vm3, %v555_v56  ;;  %v529_v60 = vadd.f32 %v2868_v39, %v528_v57  ;;  %2352 = vmatmul.mubr.msk.f32.gmra.mxu1 %vm557_vm3, %v634_v58  ;;  %2489 = vmatmul.mubr.msk.f32.gmra.mxu0 %vm557_vm3, %v1153_v59  ;;  %v1163_v26 = vld [vmem:[#allocation2 + $0xa6] sm:$0xff]  ;;  %v1453_v57 = vld [vmem:[#allocation2 + $0x37] sm:$0xff] }
 0x138   : > { %2354 = vmatprep.mubr.msk.f32.mxu1 %vm2652_vm1, %v2651_v1  ;;  %2491 = vmatprep.mubr.msk.f32.mxu0 %vm2652_vm1, %v2651_v1  ;;  %v2274_v61 = vpop.f32.mrf.mxu0  ;;  %v604_v44 = vld [vmem:[#allocation2 + $0xa8] sm:$0xff] }
 0x139   : > { %v556_v62 = vmax.f32 %v529_v60, 0.0  ;;  %v1454_v60 = vld [vmem:[#allocation2 + $0x3f] sm:$0xff] }
 0x13a   : > { %v635_v63 = vld [vmem:[#allocation2 + $0xa9] sm:$0xff] }
 0x13b   : > { %582 = vst.msk [vmem:[#allocation2 + $0xc0] sm:$0xff] %vm557_vm3, %v556_v62  ;;  %2355 = vmatmul.mubr.msk.f32.gmra.mxu1 %vm557_vm3, %v635_v63  ;;  %2492 = vmatmul.mubr.msk.f32.gmra.mxu0 %vm557_vm3, %v1154_v0  ;;  %v1164_v28 = vld [vmem:[#allocation2 + $0xae] sm:$0xff] }
 0x13c   : > { %2357 = vmatprep.mubr.msk.f32.mxu1 %vm2652_vm1, %v2651_v1  ;;  %2494 = vmatprep.mubr.msk.f32.mxu0 %vm2652_vm1, %v2651_v1  ;;  %v605_v45 = vld [vmem:[#allocation2 + $0xb0] sm:$0xff]  ;;  %v1455_v63 = vld [vmem:[#allocation2 + $0x47] sm:$0xff] }
 0x13e   : > { %v636_v39 = vld [vmem:[#allocation2 + $0xb1] sm:$0xff] }
 0x13f   : > { %2358 = vmatmul.mubr.msk.f32.gmra.mxu1 %vm557_vm3, %v636_v39  ;;  %2495 = vmatmul.mubr.msk.f32.gmra.mxu0 %vm557_vm3, %v1155_v2  ;;  %v1165_v30 = vld [vmem:[#allocation2 + $0xb6] sm:$0xff] }
 0x140   : > { %2376 = vmatprep.mubr.msk.f32.mxu1 %vm2652_vm1, %v2651_v1  ;;  %2497 = vmatprep.mubr.msk.f32.mxu0 %vm2652_vm1, %v2651_v1  ;;  %v1456_v2 = vld [vmem:[#allocation2 + $0x4f] sm:$0xff] }
 0x142   : > { %v1166_v32 = vld [vmem:[#allocation2 + $0xbe] sm:$0xff] }
 0x143   : > { %2377 = vmatmul.mubr.msk.f32.vlgmr.msra.gmra.mxu1 %vm557_vm3, %v583_v4  ;;  %2498 = vmatmul.mubr.msk.f32.gmra.mxu0 %vm557_vm3, %v1156_v5  ;;  %v1457_v5 = vld [vmem:[#allocation2 + $0x57] sm:$0xff] }
 0x144   : > { %2531 = vmatpush3.msra.mxu1 %v2009_v3  ;;  %2379 = vmatprep.mubr.msk.f32.mxu1 %vm2652_vm1, %v2651_v1 }
 0x145   : > { %2500 = vmatprep.mubr.msk.f32.mxu0 %vm2652_vm1, %v2651_v1  ;;  %2532 = vmatprep.subr.mxu1 %v2651_v1 }
 0x146   : > { %2533 = vmatpush3.msra.mxu1 %v2008_v6 }
 0x147   : > { %2380 = vmatmul.mubr.msk.f32.gmra.mxu1 %vm557_vm3, %v584_v7  ;;  %2501 = vmatmul.mubr.msk.f32.gmra.mxu0 %vm557_vm3, %v1157_v8  ;;  %v1458_v8 = vld [vmem:[#allocation2 + $0x5f] sm:$0xff] }
 0x148   : > { %2382 = vmatprep.mubr.msk.f32.mxu1 %vm2652_vm1, %v2651_v1  ;;  %2503 = vmatprep.mubr.msk.f32.mxu0 %vm2652_vm1, %v2651_v1 }
 0x149   : > { %2534 = vmatprep.subr.mxu1 %v2651_v1 }
 0x14a   : > { %2535 = vmatpush3.msra.mxu1 %v2007_v9 }
 0x14b   : > { %2383 = vmatmul.mubr.msk.f32.gmra.mxu1 %vm557_vm3, %v585_v10  ;;  %2504 = vmatmul.mubr.msk.f32.gmra.mxu0 %vm557_vm3, %v1158_v11  ;;  %v1459_v11 = vld [vmem:[#allocation2 + $0x67] sm:$0xff] }
 0x14c   : > { %2385 = vmatprep.mubr.msk.f32.mxu1 %vm2652_vm1, %v2651_v1  ;;  %2506 = vmatprep.mubr.msk.f32.mxu0 %vm2652_vm1, %v2651_v1 }
 0x14d   : > { %2536 = vmatprep.subr.mxu1 %v2651_v1 }
 0x14e   : > { %2537 = vmatpush3.msra.mxu1 %v2006_v12 }
 0x14f   : > { %2386 = vmatmul.mubr.msk.f32.gmra.mxu1 %vm557_vm3, %v586_v13  ;;  %2507 = vmatmul.mubr.msk.f32.gmra.mxu0 %vm557_vm3, %v1159_v14  ;;  %v1460_v14 = vld [vmem:[#allocation2 + $0x6f] sm:$0xff] }
 0x150   : > { %2388 = vmatprep.mubr.msk.f32.mxu1 %vm2652_vm1, %v2651_v1  ;;  %2509 = vmatprep.mubr.msk.f32.mxu0 %vm2652_vm1, %v2651_v1 }
 0x151   : > { %2538 = vmatprep.subr.mxu1 %v2651_v1 }
 0x152   : > { %2539 = vmatpush3.msra.mxu1 %v2005_v15 }
 0x153   : > { %2389 = vmatmul.mubr.msk.f32.gmra.mxu1 %vm557_vm3, %v587_v16  ;;  %2510 = vmatmul.mubr.msk.f32.gmra.mxu0 %vm557_vm3, %v1160_v17  ;;  %v1461_v17 = vld [vmem:[#allocation2 + $0x77] sm:$0xff] }
 0x154   : > { %2391 = vmatprep.mubr.msk.f32.mxu1 %vm2652_vm1, %v2651_v1  ;;  %2512 = vmatprep.mubr.msk.f32.mxu0 %vm2652_vm1, %v2651_v1 }
 0x155   : > { %2540 = vmatprep.subr.mxu1 %v2651_v1 }
 0x156   : > { %2541 = vmatpush3.msra.mxu1 %v2004_v18 }
 0x157   : > { %2392 = vmatmul.mubr.msk.f32.gmra.mxu1 %vm557_vm3, %v588_v19  ;;  %2513 = vmatmul.mubr.msk.f32.gmra.mxu0 %vm557_vm3, %v1161_v20 }
 0x158   : > { %2394 = vmatprep.mubr.msk.f32.mxu1 %vm2652_vm1, %v2651_v1  ;;  %2515 = vmatprep.mubr.msk.f32.mxu0 %vm2652_vm1, %v2651_v1 }
 0x159   : > { %2542 = vmatprep.subr.mxu1 %v2651_v1 }
 0x15a   : > { %2543 = vmatpush3.msra.mxu1 %v2003_v21 }
 0x15b   : > { %2395 = vmatmul.mubr.msk.f32.gmra.mxu1 %vm557_vm3, %v589_v22  ;;  %2516 = vmatmul.mubr.msk.f32.gmra.mxu0 %vm557_vm3, %v1162_v23  ;;  %v1462_v22 = vld [vmem:[#allocation2 + $0x7f] sm:$0xff] }
 0x15c   : > { %2397 = vmatprep.mubr.msk.f32.mxu1 %vm2652_vm1, %v2651_v1  ;;  %2518 = vmatprep.mubr.msk.f32.mxu0 %vm2652_vm1, %v2651_v1 }
 0x15d   : > { %2544 = vmatprep.subr.mxu1 %v2651_v1 }
 0x15e   : > { %2545 = vmatpush3.msra.mxu1 %v2002_v24 }
 0x15f   : > { %2398 = vmatmul.mubr.msk.f32.gmra.mxu1 %vm557_vm3, %v590_v25  ;;  %2519 = vmatmul.mubr.msk.f32.gmra.mxu0 %vm557_vm3, %v1163_v26 }
 0x160   : > { %2400 = vmatprep.mubr.msk.f32.mxu1 %vm2652_vm1, %v2651_v1  ;;  %2521 = vmatprep.mubr.msk.f32.mxu0 %vm2652_vm1, %v2651_v1 }
 0x163   : > { %2401 = vmatmul.mubr.msk.f32.gmra.mxu1 %vm557_vm3, %v591_v27  ;;  %2522 = vmatmul.mubr.msk.f32.gmra.mxu0 %vm557_vm3, %v1164_v28  ;;  %v1463_v27 = vld [vmem:[#allocation2 + $0x87] sm:$0xff] }
 0x164   : > { %2403 = vmatprep.mubr.msk.f32.mxu1 %vm2652_vm1, %v2651_v1  ;;  %2524 = vmatprep.mubr.msk.f32.mxu0 %vm2652_vm1, %v2651_v1 }
 0x167   : > { %2404 = vmatmul.mubr.msk.f32.gmra.mxu1 %vm557_vm3, %v592_v29  ;;  %2525 = vmatmul.mubr.msk.f32.gmra.mxu0 %vm557_vm3, %v1165_v30 }
 0x168   : > { %2406 = vmatprep.mubr.msk.f32.mxu1 %vm2652_vm1, %v2651_v1  ;;  %2527 = vmatprep.mubr.msk.f32.mxu0 %vm2652_vm1, %v2651_v1 }
 0x16b   : > { %2407 = vmatmul.mubr.msk.f32.gmra.mxu1 %vm557_vm3, %v593_v31  ;;  %2528 = vmatmul.mubr.msk.f32.gmra.mxu0 %vm557_vm3, %v1166_v32  ;;  %v1464_v32 = vld [vmem:[#allocation2 + $0x8f] sm:$0xff] }
 0x16c   : > { %2409 = vmatprep.mubr.msk.f32.mxu1 %vm2652_vm1, %v2651_v1 }
 0x16f   : > { %2410 = vmatmul.mubr.msk.f32.gmra.mxu1 %vm557_vm3, %v594_v33 }
 0x170   : > { %2412 = vmatprep.mubr.msk.f32.mxu1 %vm2652_vm1, %v2651_v1 }
 0x173   : > { %2413 = vmatmul.mubr.msk.f32.gmra.mxu1 %vm557_vm3, %v595_v34 }
 0x174   : > { %2415 = vmatprep.mubr.msk.f32.mxu1 %vm2652_vm1, %v2651_v1 }
 0x177   : > { %2416 = vmatmul.mubr.msk.f32.gmra.mxu1 %vm557_vm3, %v596_v35 }
 0x178   : > { %2418 = vmatprep.mubr.msk.f32.mxu1 %vm2652_vm1, %v2651_v1 }
 0x17b   : > { %2419 = vmatmul.mubr.msk.f32.gmra.mxu1 %vm557_vm3, %v597_v36 }
 0x17c   : > { %2421 = vmatprep.mubr.msk.f32.mxu1 %vm2652_vm1, %v2651_v1 }
 0x17f   : > { %2422 = vmatmul.mubr.msk.f32.gmra.mxu1 %vm557_vm3, %v598_v37  ;;  %v1465_v37 = vld [vmem:[#allocation2 + $0x97] sm:$0xff] }
 0x180   : > { %2424 = vmatprep.mubr.msk.f32.mxu1 %vm2652_vm1, %v2651_v1 }
 0x183   : > { %2425 = vmatmul.mubr.msk.f32.gmra.mxu1 %vm557_vm3, %v599_v38 }
 0x184   : > { %2427 = vmatprep.mubr.msk.f32.mxu1 %vm2652_vm1, %v2651_v1 }
 0x187   : > { %2428 = vmatmul.mubr.msk.f32.gmra.mxu1 %vm557_vm3, %v600_v40 }
 0x188   : > { %2430 = vmatprep.mubr.msk.f32.mxu1 %vm2652_vm1, %v2651_v1 }
 0x18b   : > { %2431 = vmatmul.mubr.msk.f32.gmra.mxu1 %vm557_vm3, %v601_v41 }
 0x18c   : > { %2433 = vmatprep.mubr.msk.f32.mxu1 %vm2652_vm1, %v2651_v1 }
 0x18f   : > { %2434 = vmatmul.mubr.msk.f32.gmra.mxu1 %vm557_vm3, %v602_v42 }
 0x190   : > { %2436 = vmatprep.mubr.msk.f32.mxu1 %vm2652_vm1, %v2651_v1 }
 0x193   : > { %2437 = vmatmul.mubr.msk.f32.gmra.mxu1 %vm557_vm3, %v603_v43  ;;  %v1466_v43 = vld [vmem:[#allocation2 + $0x9f] sm:$0xff] }
 0x194   : > { %2439 = vmatprep.mubr.msk.f32.mxu1 %vm2652_vm1, %v2651_v1 }
 0x197   : > { %2440 = vmatmul.mubr.msk.f32.gmra.mxu1 %vm557_vm3, %v604_v44 }
 0x198   : > { %2442 = vmatprep.mubr.msk.f32.mxu1 %vm2652_vm1, %v2651_v1 }
 0x19b   : > { %2443 = vmatmul.mubr.msk.f32.gmra.mxu1 %vm557_vm3, %v605_v45 }
 0x19c   : > { %2546 = vmatprep.mubr.msk.f32.mxu1 %vm2652_vm1, %v2651_v1 }
 0x19f   : > { %2547 = vmatmul.mubr.msk.f32.vlgmr.msra.gmra.mxu1 %vm557_vm3, %v1448_v46 }
 0x1a0   : > { %2549 = vmatprep.mubr.msk.f32.mxu1 %vm2652_vm1, %v2651_v1 }
 0x1a3   : > { %2550 = vmatmul.mubr.msk.f32.gmra.mxu1 %vm557_vm3, %v1449_v47 }
 0x1a4   : > { %2552 = vmatprep.mubr.msk.f32.mxu1 %vm2652_vm1, %v2651_v1 }
 0x1a7   : > { %v3225_v49 = vpop.f32.mrf.mxu0  ;;  %2553 = vmatmul.mubr.msk.f32.gmra.mxu1 %vm557_vm3, %v1450_v48  ;;  %v1467_v48 = vld [vmem:[#allocation2 + $0xa7] sm:$0xff] }
 0x1a8   : > { %2555 = vmatprep.mubr.msk.f32.mxu1 %vm2652_vm1, %v2651_v1 }
 0x1a9   : > { %v2293_v50 = vpop.f32.mrf.mxu0 }
 0x1ab   : > { %v3230_v52 = vpop.f32.mrf.mxu0  ;;  %2556 = vmatmul.mubr.msk.f32.gmra.mxu1 %vm557_vm3, %v1451_v51 }
 0x1ac   : > { %2558 = vmatprep.mubr.msk.f32.mxu1 %vm2652_vm1, %v2651_v1 }
 0x1ad   : > { %v2296_v53 = vpop.f32.mrf.mxu0 }
 0x1af   : > { %v3235_v55 = vpop.f32.mrf.mxu0  ;;  %2559 = vmatmul.mubr.msk.f32.gmra.mxu1 %vm557_vm3, %v1452_v54 }
 0x1b0   : > { %2561 = vmatprep.mubr.msk.f32.mxu1 %vm2652_vm1, %v2651_v1 }
 0x1b1   : > { %v2299_v56 = vpop.f32.mrf.mxu0 }
 0x1b2   : > { %v1468_v56 = vld [vmem:[#allocation2 + $0xaf] sm:$0xff] }
 0x1b3   : > { %v3240_v58 = vpop.f32.mrf.mxu0  ;;  %2562 = vmatmul.mubr.msk.f32.gmra.mxu1 %vm557_vm3, %v1453_v57 }
 0x1b4   : > { %2564 = vmatprep.mubr.msk.f32.mxu1 %vm2652_vm1, %v2651_v1 }
 0x1b5   : > { %v2302_v59 = vpop.f32.mrf.mxu0 }
 0x1b7   : > { %v3245_v61 = vpop.f32.mrf.mxu0  ;;  %2565 = vmatmul.mubr.msk.f32.gmra.mxu1 %vm557_vm3, %v1454_v60 }
 0x1b8   : > { %2567 = vmatprep.mubr.msk.f32.mxu1 %vm2652_vm1, %v2651_v1 }
 0x1b9   : > { %v2305_v62 = vpop.f32.mrf.mxu0 }
 0x1bb   : > { %v3250_v0 = vpop.f32.mrf.mxu0  ;;  %2568 = vmatmul.mubr.msk.f32.gmra.mxu1 %vm557_vm3, %v1455_v63  ;;  %v1469_v63 = vld [vmem:[#allocation2 + $0xb7] sm:$0xff] }
 0x1bc   : > { %2570 = vmatprep.mubr.msk.f32.mxu1 %vm2652_vm1, %v2651_v1 }
 0x1bd   : > { %v2308_v39 = vpop.f32.mrf.mxu0 }
 0x1bf   : > { %v3255_v3 = vpop.f32.mrf.mxu0  ;;  %2571 = vmatmul.mubr.msk.f32.gmra.mxu1 %vm557_vm3, %v1456_v2 }
 0x1c0   : > { %2573 = vmatprep.mubr.msk.f32.mxu1 %vm2652_vm1, %v2651_v1 }
 0x1c1   : > { %v2311_v4 = vpop.f32.mrf.mxu0 }
 0x1c3   : > { %v3260_v6 = vpop.f32.mrf.mxu0  ;;  %2574 = vmatmul.mubr.msk.f32.gmra.mxu1 %vm557_vm3, %v1457_v5 }
 0x1c4   : > { %2576 = vmatprep.mubr.msk.f32.mxu1 %vm2652_vm1, %v2651_v1 }
 0x1c5   : > { %v2314_v7 = vpop.f32.mrf.mxu0 }
 0x1c6   : > { %v1470_v7 = vld [vmem:[#allocation2 + $0xbf] sm:$0xff] }
 0x1c7   : > { %v3265_v9 = vpop.f32.mrf.mxu0  ;;  %2577 = vmatmul.mubr.msk.f32.gmra.mxu1 %vm557_vm3, %v1458_v8 }
 0x1c8   : > { %2579 = vmatprep.mubr.msk.f32.mxu1 %vm2652_vm1, %v2651_v1 }
 0x1c9   : > { %v2317_v10 = vpop.f32.mrf.mxu0 }
 0x1cb   : > { %v3270_v12 = vpop.f32.mrf.mxu0  ;;  %2580 = vmatmul.mubr.msk.f32.gmra.mxu1 %vm557_vm3, %v1459_v11 }
 0x1cc   : > { %2582 = vmatprep.mubr.msk.f32.mxu1 %vm2652_vm1, %v2651_v1 }
 0x1cd   : > { %v2320_v13 = vpop.f32.mrf.mxu0 }
 0x1cf   : > { %v3275_v15 = vpop.f32.mrf.mxu0  ;;  %2583 = vmatmul.mubr.msk.f32.gmra.mxu1 %vm557_vm3, %v1460_v14 }
 0x1d0   : > { %2585 = vmatprep.mubr.msk.f32.mxu1 %vm2652_vm1, %v2651_v1 }
 0x1d1   : > { %v2323_v16 = vpop.f32.mrf.mxu0 }
 0x1d3   : > { %v3280_v18 = vpop.f32.mrf.mxu1  ;;  %v3282_v19 = vpop.f32.mrf.mxu0  ;;  %2586 = vmatmul.mubr.msk.f32.gmra.mxu1 %vm557_vm3, %v1461_v17 }
 0x1d4   : > { %2588 = vmatprep.mubr.msk.f32.mxu1 %vm2652_vm1, %v2651_v1 }
 0x1d5   : > { %v2326_v20 = vpop.f32.mrf.mxu1  ;;  %v2463_v21 = vpop.f32.mrf.mxu0 }
 0x1d7   : > { %v3287_v23 = vpop.f32.mrf.mxu1  ;;  %v3289_v24 = vpop.f32.mrf.mxu0  ;;  %2589 = vmatmul.mubr.msk.f32.gmra.mxu1 %vm557_vm3, %v1462_v22 }
 0x1d8   : > { %2591 = vmatprep.mubr.msk.f32.mxu1 %vm2652_vm1, %v2651_v1 }
 0x1d9   : > { %v2329_v25 = vpop.f32.mrf.mxu1  ;;  %v2466_v26 = vpop.f32.mrf.mxu0 }
 0x1db   : > { %v3294_v28 = vpop.f32.mrf.mxu1  ;;  %v3296_v29 = vpop.f32.mrf.mxu0  ;;  %2592 = vmatmul.mubr.msk.f32.gmra.mxu1 %vm557_vm3, %v1463_v27 }
 0x1dc   : > { %2594 = vmatprep.mubr.msk.f32.mxu1 %vm2652_vm1, %v2651_v1 }
 0x1dd   : > { %v2332_v30 = vpop.f32.mrf.mxu1  ;;  %v2469_v31 = vpop.f32.mrf.mxu0 }
 0x1df   : > { %v3301_v33 = vpop.f32.mrf.mxu1  ;;  %v3303_v34 = vpop.f32.mrf.mxu0  ;;  %2595 = vmatmul.mubr.msk.f32.gmra.mxu1 %vm557_vm3, %v1464_v32 }
 0x1e0   : > { %2597 = vmatprep.mubr.msk.f32.mxu1 %vm2652_vm1, %v2651_v1 }
 0x1e1   : > { %v2335_v35 = vpop.f32.mrf.mxu1  ;;  %v2472_v36 = vpop.f32.mrf.mxu0 }
 0x1e3   : > { %v3308_v38 = vpop.f32.mrf.mxu1  ;;  %v3310_v40 = vpop.f32.mrf.mxu0  ;;  %2598 = vmatmul.mubr.msk.f32.gmra.mxu1 %vm557_vm3, %v1465_v37 }
 0x1e4   : > { %2600 = vmatprep.mubr.msk.f32.mxu1 %vm2652_vm1, %v2651_v1 }
 0x1e5   : > { %v2338_v41 = vpop.f32.mrf.mxu1  ;;  %v2475_v42 = vpop.f32.mrf.mxu0 }
 0x1e7   : > { %v3315_v44 = vpop.f32.mrf.mxu1  ;;  %v3317_v45 = vpop.f32.mrf.mxu0  ;;  %2601 = vmatmul.mubr.msk.f32.gmra.mxu1 %vm557_vm3, %v1466_v43 }
 0x1e8   : > { %2603 = vmatprep.mubr.msk.f32.mxu1 %vm2652_vm1, %v2651_v1 }
 0x1e9   : > { %v2341_v46 = vpop.f32.mrf.mxu1  ;;  %v2478_v47 = vpop.f32.mrf.mxu0 }
 0x1eb   : > { %v3322_v50 = vpop.f32.mrf.mxu1  ;;  %v3324_v51 = vpop.f32.mrf.mxu0  ;;  %2604 = vmatmul.mubr.msk.f32.gmra.mxu1 %vm557_vm3, %v1467_v48 }
 0x1ec   : > { %2606 = vmatprep.mubr.msk.f32.mxu1 %vm2652_vm1, %v2651_v1 }
 0x1ed   : > { %v2344_v53 = vpop.f32.mrf.mxu1  ;;  %v2481_v54 = vpop.f32.mrf.mxu0 }
 0x1ef   : > { %v3329_v57 = vpop.f32.mrf.mxu1  ;;  %v3331_v59 = vpop.f32.mrf.mxu0  ;;  %2607 = vmatmul.mubr.msk.f32.gmra.mxu1 %vm557_vm3, %v1468_v56 }
 0x1f0   : > { %2609 = vmatprep.mubr.msk.f32.mxu1 %vm2652_vm1, %v2651_v1 }
 0x1f1   : > { %v2347_v60 = vpop.f32.mrf.mxu1  ;;  %v2484_v62 = vpop.f32.mrf.mxu0 }
 0x1f3   : > { %v3336_v39 = vpop.f32.mrf.mxu1  ;;  %v3338_v2 = vpop.f32.mrf.mxu0  ;;  %2610 = vmatmul.mubr.msk.f32.gmra.mxu1 %vm557_vm3, %v1469_v63 }
 0x1f4   : > { %2612 = vmatprep.mubr.msk.f32.mxu1 %vm2652_vm1, %v2651_v1 }
 0x1f5   : > { %v2350_v4 = vpop.f32.mrf.mxu1  ;;  %v2487_v5 = vpop.f32.mrf.mxu0 }
 0x1f7   : > { %v3343_v8 = vpop.f32.mrf.mxu1  ;;  %v3345_v10 = vpop.f32.mrf.mxu0  ;;  %2613 = vmatmul.mubr.msk.f32.gmra.mxu1 %vm557_vm3, %v1470_v7 }
 0x1f9   : > { %v2353_v11 = vpop.f32.mrf.mxu1  ;;  %v2490_v13 = vpop.f32.mrf.mxu0 }
 0x1fb   : > { %v3348_v14 = vpop.f32.mrf.mxu1  ;;  %v3350_v16 = vpop.f32.mrf.mxu0 }
 0x1fd   : > { %v2356_v17 = vpop.f32.mrf.mxu1  ;;  %v2493_v20 = vpop.f32.mrf.mxu0 }
 0x1ff   : > { %v3352_v21 = vpop.f32.mrf.mxu1  ;;  %v3354_v1 = vpop.f32.mrf.mxu0 }
 0x201   : > { %v2359_v22 = vpop.f32.mrf.mxu1  ;;  %v2496_v25 = vpop.f32.mrf.mxu0 }
 0x203   : > { %v1030_v26 = vpop.f32.mrf.mxu1  ;;  %v3356_v27 = vpop.f32.mrf.mxu0 }
 0x204   : > { %v1031_v30 = vadd.f32 %v1030_v26, %v3225_v49 }
 0x205   : > { %v2378_v31 = vpop.f32.mrf.mxu1  ;;  %v2499_v32 = vpop.f32.mrf.mxu0 }
 0x206   : > { %v3360_v35 = vadd.f32 %v3282_v19, %v1031_v30 }
 0x207   : > { %v1035_v36 = vpop.f32.mrf.mxu1  ;;  %v3362_v37 = vpop.f32.mrf.mxu0 }
 0x208   : > { %v1036_v41 = vadd.f32 %v1035_v36, %v3230_v52 }
 0x209   : > { %v2381_v42 = vpop.f32.mrf.mxu1  ;;  %v2502_v43 = vpop.f32.mrf.mxu0 }
 0x20a   : > { %v3366_v46 = vadd.f32 %v3289_v24, %v1036_v41 }
 0x20b   : > { %v1040_v47 = vpop.f32.mrf.mxu1  ;;  %v3368_v48 = vpop.f32.mrf.mxu0 }
 0x20c   : > { %v1041_v49 = vadd.f32 %v1040_v47, %v3235_v55 }
 0x20d   : > { %v2384_v53 = vpop.f32.mrf.mxu1  ;;  %v2505_v54 = vpop.f32.mrf.mxu0 }
 0x20e   : > { %v3372_v19 = vadd.f32 %v3296_v29, %v1041_v49 }
 0x20f   : > { %v1045_v56 = vpop.f32.mrf.mxu1  ;;  %v3374_v60 = vpop.f32.mrf.mxu0 }
 0x210   : > { %v1046_v52 = vadd.f32 %v1045_v56, %v3240_v58 }
 0x211   : > { %v2387_v62 = vpop.f32.mrf.mxu1  ;;  %v2508_v63 = vpop.f32.mrf.mxu0 }
 0x212   : > { %v3378_v24 = vadd.f32 %v3303_v34, %v1046_v52 }
 0x213   : > { %v1050_v4 = vpop.f32.mrf.mxu1  ;;  %v3380_v5 = vpop.f32.mrf.mxu0 }
 0x214   : > { %v1051_v55 = vadd.f32 %v1050_v4, %v3245_v61 }
 0x215   : > { %v2390_v7 = vpop.f32.mrf.mxu1  ;;  %v2511_v11 = vpop.f32.mrf.mxu0 }
 0x216   : > { %v3384_v29 = vadd.f32 %v3310_v40, %v1051_v55 }
 0x217   : > { %v1055_v13 = vpop.f32.mrf.mxu1  ;;  %v1396_v17 = vpop.f32.mrf.mxu0 }
 0x218   : > { %v1056_v20 = vadd.f32 %v1055_v13, %v3250_v0 }
 0x219   : > { %v2393_v58 = vpop.f32.mrf.mxu1  ;;  %v2514_v22 = vpop.f32.mrf.mxu0 }
 0x21a   : > { %v3388_v25 = vadd.f32 %v3317_v45, %v1056_v20 }
 0x21b   : > { %v1060_v34 = vpop.f32.mrf.mxu1  ;;  %v1401_v26 = vpop.f32.mrf.mxu0 }
 0x21c   : > { %v1061_v30 = vadd.f32 %v1060_v34, %v3255_v3 }
 0x21d   : > { %v2396_v31 = vpop.f32.mrf.mxu1  ;;  %v2517_v61 = vpop.f32.mrf.mxu0 }
 0x21e   : > { %v3392_v32 = vadd.f32 %v3324_v51, %v1061_v30 }
 0x21f   : > { %v1065_v40 = vpop.f32.mrf.mxu1  ;;  %v1406_v36 = vpop.f32.mrf.mxu0 }
 0x220   : > { %v1066_v41 = vadd.f32 %v1065_v40, %v3260_v6 }
 0x221   : > { %v2399_v42 = vpop.f32.mrf.mxu1  ;;  %v2520_v0 = vpop.f32.mrf.mxu0 }
 0x222   : > { %v3396_v43 = vadd.f32 %v3331_v59, %v1066_v41 }
 0x223   : > { %v1070_v45 = vpop.f32.mrf.mxu1  ;;  %v1411_v47 = vpop.f32.mrf.mxu0 }
 0x224   : > { %v1071_v49 = vadd.f32 %v1070_v45, %v3265_v9 }
 0x225   : > { %v2402_v53 = vpop.f32.mrf.mxu1  ;;  %v2523_v3 = vpop.f32.mrf.mxu0 }
 0x226   : > { %v3400_v54 = vadd.f32 %v3338_v2, %v1071_v49 }
 0x227   : > { %v1075_v51 = vpop.f32.mrf.mxu1  ;;  %v1416_v56 = vpop.f32.mrf.mxu0 }
 0x228   : > { %v1076_v52 = vadd.f32 %v1075_v51, %v3270_v12 }
 0x229   : > { %v2405_v62 = vpop.f32.mrf.mxu1  ;;  %v2526_v6 = vpop.f32.mrf.mxu0 }
 0x22a   : > { %v3404_v63 = vadd.f32 %v3345_v10, %v1076_v52 }
 0x22b   : > { %v1080_v59 = vpop.f32.mrf.mxu1  ;;  %v1421_v4 = vpop.f32.mrf.mxu0 }
 0x22c   : > { %v1081_v55 = vadd.f32 %v1080_v59, %v3275_v15 }
 0x22d   : > { %v2408_v7 = vpop.f32.mrf.mxu1  ;;  %v2529_v9 = vpop.f32.mrf.mxu0 }
 0x22e   : > { %v3408_v11 = vadd.f32 %v3350_v16, %v1081_v55 }
 0x22f   : > { %v1085_v2 = vpop.f32.mrf.mxu1 }
 0x230   : > { %v1086_v13 = vadd.f32 %v1085_v2, %v3280_v18 }
 0x231   : > { %v2411_v20 = vpop.f32.mrf.mxu1 }
 0x232   : > { %v3412_v12 = vadd.f32 %v3354_v1, %v1086_v13 }
 0x233   : > { %v1090_v58 = vpop.f32.mrf.mxu1 }
 0x234   : > { %v1091_v10 = vadd.f32 %v1090_v58, %v3287_v23 }
 0x235   : > { %v2414_v22 = vpop.f32.mrf.mxu1 }
 0x236   : > { %v3416_v34 = vadd.f32 %v3356_v27, %v1091_v10 }
 0x237   : > { %v1095_v15 = vpop.f32.mrf.mxu1 }
 0x238   : > { %v1096_v30 = vadd.f32 %v1095_v15, %v3294_v28 }
 0x239   : > { %v2417_v31 = vpop.f32.mrf.mxu1 }
 0x23a   : > { %v3420_v16 = vadd.f32 %v3362_v37, %v1096_v30 }
 0x23b   : > { %v1100_v61 = vpop.f32.mrf.mxu1 }
 0x23c   : > { %v1101_v18 = vadd.f32 %v1100_v61, %v3301_v33 }
 0x23d   : > { %v2420_v40 = vpop.f32.mrf.mxu1 }
 0x23e   : > { %v3424_v1 = vadd.f32 %v3368_v48, %v1101_v18 }
 0x23f   : > { %v1105_v41 = vpop.f32.mrf.mxu1 }
 0x240   : > { %v1106_v23 = vadd.f32 %v1105_v41, %v3308_v38 }
 0x241   : > { %v2423_v42 = vpop.f32.mrf.mxu1 }
 0x242   : > { %v3428_v27 = vadd.f32 %v3374_v60, %v1106_v23 }
 0x243   : > { %v1110_v0 = vpop.f32.mrf.mxu1 }
 0x244   : > { %v1111_v28 = vadd.f32 %v1110_v0, %v3315_v44 }
 0x245   : > { %v2426_v45 = vpop.f32.mrf.mxu1 }
 0x246   : > { %v3432_v37 = vadd.f32 %v3380_v5, %v1111_v28 }
 0x247   : > { %v1115_v49 = vpop.f32.mrf.mxu1 }
 0x248   : > { %v1116_v33 = vadd.f32 %v1115_v49, %v3322_v50 }
 0x249   : > { %v2429_v53 = vpop.f32.mrf.mxu1 }
 0x24a   : > { %v3435_v48 = vadd.f32 %v1396_v17, %v1116_v33 }
 0x24b   : > { %v1120_v3 = vpop.f32.mrf.mxu1 }
 0x24c   : > { %v1121_v38 = vadd.f32 %v1120_v3, %v3329_v57 }
 0x24d   : > { %v2432_v51 = vpop.f32.mrf.mxu1 }
 0x24e   : > { %v3438_v52 = vadd.f32 %v1401_v26, %v1121_v38 }
 0x24f   : > { %v1125_v60 = vpop.f32.mrf.mxu1 }
 0x250   : > { %v1126_v44 = vadd.f32 %v1125_v60, %v3336_v39 }
 0x251   : > { %v2435_v62 = vpop.f32.mrf.mxu1 }
 0x252   : > { %v3441_v6 = vadd.f32 %v1406_v36, %v1126_v44 }
 0x253   : > { %v1130_v5 = vpop.f32.mrf.mxu1 }
 0x254   : > { %v1131_v59 = vadd.f32 %v1130_v5, %v3343_v8  ;;  %v3456_v8 = vld [vmem:[%s3562_s4] ss:$0 sm:$0xff] }
 0x255   : > { %v2438_v50 = vpop.f32.mrf.mxu1 }
 0x256   : > { %v3444_v55 = vadd.f32 %v1411_v47, %v1131_v59 }
 0x257   : > { %v1135_v17 = vpop.f32.mrf.mxu1 }
 0x258   : > { %v1136_v7 = vadd.f32 %v1135_v17, %v3348_v14 }
 0x259   : > { %v2441_v57 = vpop.f32.mrf.mxu1 }
 0x25a   : > { %v3447_v9 = vadd.f32 %v1416_v56, %v1136_v7 }
 0x25b   : > { %v1140_v26 = vpop.f32.mrf.mxu1 }
 0x25c   : > { %v1141_v2 = vadd.f32 %v1140_v26, %v3352_v21 }
 0x25d   : > { %v2444_v13 = vpop.f32.mrf.mxu1 }
 0x25e   : > { %v3450_v39 = vadd.f32 %v1421_v4, %v1141_v2 }
 0x25f   : > { %v1615_v36 = vpop.f32.mrf.mxu1 }
 0x260   : > { %v1729_v47 = vadd.f32 %v1615_v36, %v3360_v35 }
 0x261   : > { %v2548_v20 = vpop.f32.mrf.mxu1 }
 0x262   : > { %v1759_v14 = vadd.f32 %v3456_v8, %v1729_v47 }
 0x263   : > { %v1620_v21 = vpop.f32.mrf.mxu1 }
 0x264   : > { %v1782_v56 = vmax.f32 %v1759_v14, 0.0  ;;  %v1730_v4 = vadd.f32 %v1620_v21, %v3366_v46 }
 0x265   : > { %v2551_v58 = vpop.f32.mrf.mxu1 }
 0x266   : > { %1805 = vst.msk [vmem:[%s3463_s11] sm:$0xff] %vm557_vm3, %v1782_v56  ;;  %v1760_v35 = vadd.f32 %v3456_v8, %v1730_v4 }
 0x267   : > { %v1625_v10 = vpop.f32.mrf.mxu1 }
 0x268   : > { %v1783_v22 = vmax.f32 %v1760_v35, 0.0  ;;  %v1731_v15 = vadd.f32 %v1625_v10, %v3372_v19 }
 0x269   : > { %v2554_v30 = vpop.f32.mrf.mxu1 }
 0x26a   : > { %1806 = vst.msk [vmem:[%s3463_s11 + $0x8] sm:$0xff] %vm557_vm3, %v1783_v22  ;;  %v1761_v31 = vadd.f32 %v3456_v8, %v1731_v15 }
 0x26b   : > { %v1630_v61 = vpop.f32.mrf.mxu1 }
 0x26c   : > { %v1784_v18 = vmax.f32 %v1761_v31, 0.0  ;;  %v1732_v46 = vadd.f32 %v1630_v61, %v3378_v24 }
 0x26d   : > { %v2557_v40 = vpop.f32.mrf.mxu1 }
 0x26e   : > { %1807 = vst.msk [vmem:[%s3463_s11 + $0x10] sm:$0xff] %vm557_vm3, %v1784_v18  ;;  %v1762_v41 = vadd.f32 %v3456_v8, %v1732_v46 }
 0x26f   : > { %v1635_v23 = vpop.f32.mrf.mxu1 }
 0x270   : > { %v1785_v42 = vmax.f32 %v1762_v41, 0.0  ;;  %v1733_v19 = vadd.f32 %v1635_v23, %v3384_v29 }
 0x271   : > { %v2560_v0 = vpop.f32.mrf.mxu1 }
 0x272   : > { %1808 = vst.msk [vmem:[%s3463_s11 + $0x18] sm:$0xff] %vm557_vm3, %v1785_v42  ;;  %v1763_v28 = vadd.f32 %v3456_v8, %v1733_v19 }
 0x273   : > { %v1640_v45 = vpop.f32.mrf.mxu1 }
 0x274   : > { %v1786_v49 = vmax.f32 %v1763_v28, 0.0  ;;  %v1734_v24 = vadd.f32 %v1640_v45, %v3388_v25 }
 0x275   : > { %v2563_v33 = vpop.f32.mrf.mxu1 }
 0x276   : > { %1809 = vst.msk [vmem:[%s3463_s11 + $0x20] sm:$0xff] %vm557_vm3, %v1786_v49  ;;  %v1764_v53 = vadd.f32 %v3456_v8, %v1734_v24 }
 0x277   : > { %v1645_v3 = vpop.f32.mrf.mxu1 }
 0x278   : > { %v1787_v38 = vmax.f32 %v1764_v53, 0.0  ;;  %v1735_v29 = vadd.f32 %v1645_v3, %v3392_v32 }
 0x279   : > { %v2566_v51 = vpop.f32.mrf.mxu1 }
 0x27a   : > { %1810 = vst.msk [vmem:[%s3463_s11 + $0x28] sm:$0xff] %vm557_vm3, %v1787_v38  ;;  %v1765_v60 = vadd.f32 %v3456_v8, %v1735_v29 }
 0x27b   : > { %v1650_v44 = vpop.f32.mrf.mxu1 }
 0x27c   : > { %v1788_v62 = vmax.f32 %v1765_v60, 0.0  ;;  %v1736_v25 = vadd.f32 %v1650_v44, %v3396_v43 }
 0x27d   : > { %v2569_v5 = vpop.f32.mrf.mxu1 }
 0x27e   : > { %1811 = vst.msk [vmem:[%s3463_s11 + $0x30] sm:$0xff] %vm557_vm3, %v1788_v62  ;;  %v1766_v59 = vadd.f32 %v3456_v8, %v1736_v25 }
 0x27f   : > { %v1655_v50 = vpop.f32.mrf.mxu1 }
 0x280   : > { %v1789_v17 = vmax.f32 %v1766_v59, 0.0  ;;  %v1737_v32 = vadd.f32 %v1655_v50, %v3400_v54 }
 0x281   : > { %v2572_v7 = vpop.f32.mrf.mxu1 }
 0x282   : > { %1812 = vst.msk [vmem:[%s3463_s11 + $0x38] sm:$0xff] %vm557_vm3, %v1789_v17  ;;  %v1767_v57 = vadd.f32 %v3456_v8, %v1737_v32 }
 0x283   : > { %v1660_v26 = vpop.f32.mrf.mxu1 }
 0x284   : > { %v1790_v2 = vmax.f32 %v1767_v57, 0.0  ;;  %v1738_v43 = vadd.f32 %v1660_v26, %v3404_v63 }
 0x285   : > { %v2575_v13 = vpop.f32.mrf.mxu1 }
 0x286   : > { %1813 = vst.msk [vmem:[%s3463_s11 + $0x40] sm:$0xff] %vm557_vm3, %v1790_v2  ;;  %v1768_v36 = vadd.f32 %v3456_v8, %v1738_v43 }
 0x287   : > { %v1665_v47 = vpop.f32.mrf.mxu1 }
 0x288   : > { %v1791_v20 = vmax.f32 %v1768_v36, 0.0  ;;  %v1739_v54 = vadd.f32 %v1665_v47, %v3408_v11 }
 0x289   : > { %v2578_v14 = vpop.f32.mrf.mxu1 }
 0x28a   : > { %1814 = vst.msk [vmem:[%s3463_s11 + $0x48] sm:$0xff] %vm557_vm3, %v1791_v20  ;;  %v1769_v21 = vadd.f32 %v3456_v8, %v1739_v54 }
 0x28b   : > { %v1670_v56 = vpop.f32.mrf.mxu1 }
 0x28c   : > { %v1792_v4 = vmax.f32 %v1769_v21, 0.0  ;;  %v1740_v63 = vadd.f32 %v1670_v56, %v3412_v12 }
 0x28d   : > { %v2581_v58 = vpop.f32.mrf.mxu1 }
 0x28e   : > { %1815 = vst.msk [vmem:[%s3463_s11 + $0x50] sm:$0xff] %vm557_vm3, %v1792_v4  ;;  %v1770_v35 = vadd.f32 %v3456_v8, %v1740_v63 }
 0x28f   : > { %v1675_v10 = vpop.f32.mrf.mxu1 }
 0x290   : > { %v1793_v22 = vmax.f32 %v1770_v35, 0.0  ;;  %v1741_v11 = vadd.f32 %v1675_v10, %v3416_v34 }
 0x291   : > { %v2584_v15 = vpop.f32.mrf.mxu1 }
 0x292   : > { %1816 = vst.msk [vmem:[%s3463_s11 + $0x58] sm:$0xff] %vm557_vm3, %v1793_v22  ;;  %v1771_v30 = vadd.f32 %v3456_v8, %v1741_v11 }
 0x293   : > { %v1680_v31 = vpop.f32.mrf.mxu1 }
 0x294   : > { %v1794_v61 = vmax.f32 %v1771_v30, 0.0  ;;  %v1742_v12 = vadd.f32 %v1680_v31, %v3420_v16 }
 0x295   : > { %v2587_v18 = vpop.f32.mrf.mxu1 }
 0x296   : > { %1817 = vst.msk [vmem:[%s3463_s11 + $0x60] sm:$0xff] %vm557_vm3, %v1794_v61  ;;  %v1772_v46 = vadd.f32 %v3456_v8, %v1742_v12 }
 0x297   : > { %v1685_v40 = vpop.f32.mrf.mxu1 }
 0x298   : > { %v1795_v41 = vmax.f32 %v1772_v46, 0.0  ;;  %v1743_v34 = vadd.f32 %v1685_v40, %v3424_v1 }
 0x299   : > { %v2590_v23 = vpop.f32.mrf.mxu1 }
 0x29a   : > { %1818 = vst.msk [vmem:[%s3463_s11 + $0x68] sm:$0xff] %vm557_vm3, %v1795_v41  ;;  %v1773_v42 = vadd.f32 %v3456_v8, %v1743_v34 }
 0x29b   : > { %v1690_v19 = vpop.f32.mrf.mxu1 }
 0x29c   : > { %v1796_v0 = vmax.f32 %v1773_v42, 0.0  ;;  %v1744_v16 = vadd.f32 %v1690_v19, %v3428_v27 }
 0x29d   : > { %v2593_v28 = vpop.f32.mrf.mxu1 }
 0x29e   : > { %1819 = vst.msk [vmem:[%s3463_s11 + $0x70] sm:$0xff] %vm557_vm3, %v1796_v0  ;;  %v1774_v45 = vadd.f32 %v3456_v8, %v1744_v16 }
 0x29f   : > { %v1695_v49 = vpop.f32.mrf.mxu1 }
 0x2a0   : > { %v1797_v24 = vmax.f32 %v1774_v45, 0.0  ;;  %v1745_v1 = vadd.f32 %v1695_v49, %v3432_v37 }
 0x2a1   : > { %v2596_v33 = vpop.f32.mrf.mxu1 }
 0x2a2   : > { %1820 = vst.msk [vmem:[%s3463_s11 + $0x78] sm:$0xff] %vm557_vm3, %v1797_v24  ;;  %v1775_v53 = vadd.f32 %v3456_v8, %v1745_v1 }
 0x2a3   : > { %v1700_v3 = vpop.f32.mrf.mxu1 }
 0x2a4   : > { %v1798_v38 = vmax.f32 %v1775_v53, 0.0  ;;  %v1746_v27 = vadd.f32 %v1700_v3, %v3435_v48 }
 0x2a5   : > { %v2599_v29 = vpop.f32.mrf.mxu1 }
 0x2a6   : > { %1821 = vst.msk [vmem:[%s3463_s11 + $0x80] sm:$0xff] %vm557_vm3, %v1798_v38  ;;  %v1776_v51 = vadd.f32 %v3456_v8, %v1746_v27 }
 0x2a7   : > { %v1705_v60 = vpop.f32.mrf.mxu1 }
 0x2a8   : > { %v1799_v44 = vmax.f32 %v1776_v51, 0.0  ;;  %v1747_v37 = vadd.f32 %v1705_v60, %v3438_v52 }
 0x2a9   : > { %v2602_v62 = vpop.f32.mrf.mxu1 }
 0x2aa   : > { %1822 = vst.msk [vmem:[%s3463_s11 + $0x88] sm:$0xff] %vm557_vm3, %v1799_v44  ;;  %v1777_v25 = vadd.f32 %v3456_v8, %v1747_v37 }
 0x2ab   : > { %v1710_v5 = vpop.f32.mrf.mxu1 }
 0x2ac   : > { %v1800_v59 = vmax.f32 %v1777_v25, 0.0  ;;  %v1748_v48 = vadd.f32 %v1710_v5, %v3441_v6 }
 0x2ad   : > { %v2605_v50 = vpop.f32.mrf.mxu1 }
 0x2ae   : > { %1823 = vst.msk [vmem:[%s3463_s11 + $0x90] sm:$0xff] %vm557_vm3, %v1800_v59  ;;  %v1778_v17 = vadd.f32 %v3456_v8, %v1748_v48 }
 0x2af   : > { %v1715_v32 = vpop.f32.mrf.mxu1 }
 0x2b0   : > { %v1801_v7 = vmax.f32 %v1778_v17, 0.0  ;;  %v1749_v52 = vadd.f32 %v1715_v32, %v3444_v55 }
 0x2b1   : > { %v2608_v57 = vpop.f32.mrf.mxu1 }
 0x2b2   : > { %1824 = vst.msk [vmem:[%s3463_s11 + $0x98] sm:$0xff] %vm557_vm3, %v1801_v7  ;;  %v1779_v26 = vadd.f32 %v3456_v8, %v1749_v52 }
 0x2b3   : > { %v1720_v2 = vpop.f32.mrf.mxu1 }
 0x2b4   : > { %v1802_v43 = vmax.f32 %v1779_v26, 0.0  ;;  %v1750_v6 = vadd.f32 %v1720_v2, %v3447_v9 }
 0x2b5   : > { %v2611_v13 = vpop.f32.mrf.mxu1 }
 0x2b6   : > { %1825 = vst.msk [vmem:[%s3463_s11 + $0xa0] sm:$0xff] %vm557_vm3, %v1802_v43  ;;  %v1780_v36 = vadd.f32 %v3456_v8, %v1750_v6 }
 0x2b7   : > { %v1725_v47 = vpop.f32.mrf.mxu1 }
 0x2b8   : > { %v1803_v20 = vmax.f32 %v1780_v36, 0.0  ;;  %v1751_v54 = vadd.f32 %v1725_v47, %v3450_v39 }
 0x2b9   : > { %v2614_v55 = vpop.f32.mrf.mxu1 }
 0x2ba   : > { %1826 = vst.msk [vmem:[%s3463_s11 + $0xa8] sm:$0xff] %vm557_vm3, %v1803_v20  ;;  %v1781_v14 = vadd.f32 %v3456_v8, %v1751_v54 }
 0x2bc   : > { %v1804_v21 = vmax.f32 %v1781_v14, 0.0 }
 0x2be   : > { %1827 = vst.msk [vmem:[%s3463_s11 + $0xb0] sm:$0xff] %vm557_vm3, %v1804_v21 }
 0x2bf PF: > { %s15_s18 = sadd.s32 1, %s2649_s18  }
 0x2c0   : > { %p12_p4 = scmp.ge.s32.totalorder %s15_s18, 4  }
 0x2c2   :  { %14 = sbr.rel (!%p12_p4) target bundleno = 1 (0x1), region = 73 }

// kernel: traced_net_forward.3
= control target key start
LH: loop header
LB: loop body
LE: loop exit
PB: predicated region body
PF: predicated region fallthrough
CT: control target
= control target key end

     0   :  { %v249_v3 = vlaneseq  ;;  %v4020_v7 = vmov 1983009808   ;;  %s4717_s0 = inlined_call_operand.vmem [shape: f32[2,11776], index: 0, kind: input, shape index: {}]   ;;  %s4718_s1 = inlined_call_operand.vmem [shape: f32[16,11776], index: 1, kind: input, shape index: {}]   ;;  %s4719_s2 = inlined_call_operand.vmem [shape: f32[1,10], index: 2, kind: input, shape index: {}]   ;;  %s4720_s3 = inlined_call_operand.hbm [shape: f32[2,10], index: 3, kind: output, shape index: {}]  }
   0x1   :  { %v131_v0 = vld [vmem:[%s4718_s1 + $0x2e8] sm:$0xff]  ;;  %v133_v1 = vld [vmem:[%s4718_s1 + $0x2f8] sm:$0xff]  ;;  %v130_v2 = vld [vmem:[%s4718_s1 + $0x2e0] sm:$0xff]  ;;  %v247_v8 = vunpack.c.l.s4 %v4020_v7 }
   0x2   :  { %756 = vmatprep.subr.mxu0 %v131_v0  ;;  %826 = vmatprep.subr.mxu1 %v133_v1  ;;  %v132_v4 = vld [vmem:[%s4718_s1 + $0x2f0] sm:$0xff]  ;;  %v39_v5 = vld [vmem:[%s4718_s1 + $0x8] sm:$0xff]  ;;  %v41_v6 = vld [vmem:[%s4718_s1 + $0x18] sm:$0xff]  ;;  %v250_v10 = vshrl.u32 %v249_v3, 7 }
   0x3   :  { %757 = vmatpush1.xpose.msra.mxu0 %v130_v2  ;;  %827 = vmatpush1.xpose.msra.mxu1 %v132_v4  ;;  %v15_v9 = vld [vmem:[%s4717_s0] sm:$0xff]  ;;  %v40_v12 = vld [vmem:[%s4718_s1 + $0x10] sm:$0xff]  ;;  %v248_v13 = vunpack.c.0.s8 %v247_v8  ;;  %v135_v15 = vld [vmem:[%s4718_s1 + $0x308] sm:$0xff] }
   0x4   :  { %758 = vmatprep.subr.mxu0 %v39_v5  ;;  %828 = vmatprep.subr.mxu1 %v41_v6  ;;  %v38_v11 = vld [vmem:[%s4718_s1] sm:$0xff]  ;;  %v245_v14 = vcombine.high %v15_v9, %v15_v9  ;;  %v137_v16 = vld [vmem:[%s4718_s1 + $0x318] sm:$0xff]  ;;  %v16_v18 = vld [vmem:[%s4717_s0 + $0x8] sm:$0xff] }
   0x5   :  { %v4075_v17 = vsub.s32 %v248_v13, %v250_v10  ;;  %v262_v19 = vcombine.high %v16_v18, %v16_v18  ;;  %v17_v24 = vld [vmem:[%s4717_s0 + $0x10] sm:$0xff]  ;;  %v134_v27 = vld [vmem:[%s4718_s1 + $0x300] sm:$0xff]  ;;  %v43_v29 = vld [vmem:[%s4718_s1 + $0x28] sm:$0xff] }
   0x6   :  { %v136_v28 = vld [vmem:[%s4718_s1 + $0x310] sm:$0xff]  ;;  %v45_v30 = vld [vmem:[%s4718_s1 + $0x38] sm:$0xff]  ;;  %v279_v33 = vcombine.high %v17_v24, %v17_v24  ;;  %v42_v34 = vld [vmem:[%s4718_s1 + $0x20] sm:$0xff] }
   0x7   :  { %759 = vmatpush1.xpose.msra.mxu0 %v38_v11  ;;  %829 = vmatpush1.xpose.msra.mxu1 %v40_v12  ;;  %v252_v20 = vrot.slane %v15_v9, %v4075_v17  ;;  %v259_v21 = vrot.slane %v245_v14, %v4075_v17  ;;  %v269_v22 = vrot.slane %v16_v18, %v4075_v17  ;;  %v44_v35 = vld [vmem:[%s4718_s1 + $0x30] sm:$0xff]  ;;  %v139_v36 = vld [vmem:[%s4718_s1 + $0x328] sm:$0xff]  ;;  %v141_v37 = vld [vmem:[%s4718_s1 + $0x338] sm:$0xff] }
   0x8   :  { %896 = vmatprep.subr.mxu0 %v135_v15  ;;  %966 = vmatprep.subr.mxu1 %v137_v16  ;;  %v276_v23 = vrot.slane %v262_v19, %v4075_v17  ;;  %v286_v38 = vrot.slane %v17_v24, %v4075_v17  ;;  %v293_v39 = vrot.slane %v279_v33, %v4075_v17  ;;  %v18_v40 = vld [vmem:[%s4717_s0 + $0x18] sm:$0xff]  ;;  %v138_v41 = vld [vmem:[%s4718_s1 + $0x320] sm:$0xff]  ;;  %v140_v42 = vld [vmem:[%s4718_s1 + $0x330] sm:$0xff] }
   0x9   :  { %v260_v25 = vcombine.high %v252_v20, %v252_v20  ;;  %v261_v26 = vcombine.high %v259_v21, %v259_v21  ;;  %v277_v31 = vcombine.high %v269_v22, %v269_v22  ;;  %v47_v43 = vld [vmem:[%s4718_s1 + $0x48] sm:$0xff]  ;;  %v49_v44 = vld [vmem:[%s4718_s1 + $0x58] sm:$0xff]  ;;  %v296_v47 = vcombine.high %v18_v40, %v18_v40  ;;  %v46_v48 = vld [vmem:[%s4718_s1 + $0x40] sm:$0xff] }
   0xa   :  { %v278_v32 = vcombine.high %v276_v23, %v276_v23  ;;  %v294_v45 = vcombine.high %v286_v38, %v286_v38  ;;  %v295_v46 = vcombine.high %v293_v39, %v293_v39  ;;  %v48_v49 = vld [vmem:[%s4718_s1 + $0x50] sm:$0xff]  ;;  %v143_v50 = vld [vmem:[%s4718_s1 + $0x348] sm:$0xff]  ;;  %v145_v51 = vld [vmem:[%s4718_s1 + $0x358] sm:$0xff]  ;;  %v303_v52 = vrot.slane %v18_v40, %v4075_v17 }
   0xb   :  { %792 = vmatprep.mubr.f32.mxu0 %v260_v25  ;;  %862 = vmatprep.mubr.f32.mxu1 %v261_v26  ;;  %v310_v53 = vrot.slane %v296_v47, %v4075_v17  ;;  %v19_v54 = vld [vmem:[%s4717_s0 + $0x20] sm:$0xff]  ;;  %v144_v56 = vld [vmem:[%s4718_s1 + $0x350] sm:$0xff]  ;;  %v51_v57 = vld [vmem:[%s4718_s1 + $0x68] sm:$0xff] }
   0xc   :  { %793 = vmatmul.mubr.f32.vlgmr.msra.gmra.mxu0 %v252_v20  ;;  %863 = vmatmul.mubr.f32.vlgmr.msra.gmra.mxu1 %v259_v21  ;;  %v142_v55 = vld [vmem:[%s4718_s1 + $0x340] sm:$0xff]  ;;  %v53_v58 = vld [vmem:[%s4718_s1 + $0x78] sm:$0xff]  ;;  %v311_v59 = vcombine.high %v303_v52, %v303_v52  ;;  %v313_v61 = vcombine.high %v19_v54, %v19_v54  ;;  %v52_v63 = vld [vmem:[%s4718_s1 + $0x70] sm:$0xff]  ;;  %v320_v2 = vrot.slane %v19_v54, %v4075_v17 }
   0xd   :  { %897 = vmatpush1.xpose.msra.mxu0 %v134_v27  ;;  %967 = vmatpush1.xpose.msra.mxu1 %v136_v28  ;;  %v312_v60 = vcombine.high %v310_v53, %v310_v53  ;;  %v50_v62 = vld [vmem:[%s4718_s1 + $0x60] sm:$0xff]  ;;  %v147_v0 = vld [vmem:[%s4718_s1 + $0x368] sm:$0xff]  ;;  %v149_v1 = vld [vmem:[%s4718_s1 + $0x378] sm:$0xff] }
   0xe   :  { %898 = vmatprep.subr.mxu0 %v43_v29  ;;  %968 = vmatprep.subr.mxu1 %v45_v30  ;;  %v327_v3 = vrot.slane %v313_v61, %v4075_v17  ;;  %v20_v4 = vld [vmem:[%s4717_s0 + $0x28] sm:$0xff]  ;;  %v146_v5 = vld [vmem:[%s4718_s1 + $0x360] sm:$0xff]  ;;  %v148_v6 = vld [vmem:[%s4718_s1 + $0x370] sm:$0xff]  ;;  %v328_v9 = vcombine.high %v320_v2, %v320_v2 }
   0xf   :  { %932 = vmatprep.mubr.f32.mxu0 %v277_v31  ;;  %1002 = vmatprep.mubr.f32.mxu1 %v278_v32  ;;  %v55_v7 = vld [vmem:[%s4718_s1 + $0x88] sm:$0xff]  ;;  %v57_v8 = vld [vmem:[%s4718_s1 + $0x98] sm:$0xff]  ;;  %v330_v11 = vcombine.high %v20_v4, %v20_v4  ;;  %v54_v12 = vld [vmem:[%s4718_s1 + $0x80] sm:$0xff]  ;;  %v337_v16 = vrot.slane %v20_v4, %v4075_v17 }
  0x10   :  { %v329_v10 = vcombine.high %v327_v3, %v327_v3  ;;  %v56_v13 = vld [vmem:[%s4718_s1 + $0x90] sm:$0xff]  ;;  %v151_v14 = vld [vmem:[%s4718_s1 + $0x388] sm:$0xff]  ;;  %v153_v15 = vld [vmem:[%s4718_s1 + $0x398] sm:$0xff] }
  0x11   :  { %899 = vmatpush1.xpose.msra.mxu0 %v42_v34  ;;  %969 = vmatpush1.xpose.msra.mxu1 %v44_v35  ;;  %v344_v18 = vrot.slane %v330_v11, %v4075_v17  ;;  %v21_v19 = vld [vmem:[%s4717_s0 + $0x30] sm:$0xff]  ;;  %v150_v20 = vld [vmem:[%s4718_s1 + $0x380] sm:$0xff]  ;;  %v345_v24 = vcombine.high %v337_v16, %v337_v16  ;;  %v155_v29 = vld [vmem:[%s4718_s1 + $0x3a8] sm:$0xff] }
  0x12   :  { %1036 = vmatprep.subr.mxu0 %v139_v36  ;;  %1106 = vmatprep.subr.mxu1 %v141_v37  ;;  %v152_v21 = vld [vmem:[%s4718_s1 + $0x390] sm:$0xff]  ;;  %v347_v26 = vcombine.high %v21_v19, %v21_v19  ;;  %v58_v27 = vld [vmem:[%s4718_s1 + $0xa0] sm:$0xff]  ;;  %v157_v30 = vld [vmem:[%s4718_s1 + $0x3b8] sm:$0xff]  ;;  %v354_v31 = vrot.slane %v21_v19, %v4075_v17 }
  0x13   :  { %v346_v25 = vcombine.high %v344_v18, %v344_v18  ;;  %v60_v28 = vld [vmem:[%s4718_s1 + $0xb0] sm:$0xff]  ;;  %v22_v33 = vld [vmem:[%s4717_s0 + $0x38] sm:$0xff]  ;;  %v154_v34 = vld [vmem:[%s4718_s1 + $0x3a0] sm:$0xff] }
  0x14   :  { %933 = vmatmul.mubr.f32.vlgmr.msra.gmra.mxu0 %v269_v22  ;;  %1003 = vmatmul.mubr.f32.vlgmr.msra.gmra.mxu1 %v276_v23  ;;  %v59_v22 = vld [vmem:[%s4718_s1 + $0xa8] sm:$0xff]  ;;  %v61_v23 = vld [vmem:[%s4718_s1 + $0xb8] sm:$0xff]  ;;  %v361_v32 = vrot.slane %v347_v26, %v4075_v17  ;;  %v156_v35 = vld [vmem:[%s4718_s1 + $0x3b0] sm:$0xff]  ;;  %v364_v40 = vcombine.high %v22_v33, %v22_v33 }
  0x15   :  { %1037 = vmatpush1.xpose.msra.mxu0 %v138_v41  ;;  %1107 = vmatpush1.xpose.msra.mxu1 %v140_v42  ;;  %v63_v36 = vld [vmem:[%s4718_s1 + $0xc8] sm:$0xff]  ;;  %v65_v37 = vld [vmem:[%s4718_s1 + $0xd8] sm:$0xff]  ;;  %v62_v41 = vld [vmem:[%s4718_s1 + $0xc0] sm:$0xff] }
  0x16   :  { %1038 = vmatprep.subr.mxu0 %v47_v43  ;;  %1108 = vmatprep.subr.mxu1 %v49_v44  ;;  %v64_v42 = vld [vmem:[%s4718_s1 + $0xd0] sm:$0xff]  ;;  %v159_v43 = vld [vmem:[%s4718_s1 + $0x3c8] sm:$0xff]  ;;  %v161_v44 = vld [vmem:[%s4718_s1 + $0x3d8] sm:$0xff] }
  0x17   :  { %1072 = vmatprep.mubr.f32.mxu0 %v294_v45  ;;  %1142 = vmatprep.mubr.f32.mxu1 %v295_v46  ;;  %v371_v45 = vrot.slane %v22_v33, %v4075_v17  ;;  %v378_v46 = vrot.slane %v364_v40, %v4075_v17  ;;  %v23_v47 = vld [vmem:[%s4717_s0 + $0x40] sm:$0xff]  ;;  %v24_v61 = vld [vmem:[%s4717_s0 + $0x48] sm:$0xff] }
  0x18   :  { %v381_v54 = vcombine.high %v23_v47, %v23_v47  ;;  %v398_v4 = vcombine.high %v24_v61, %v24_v61 }
  0x19   :  { %1039 = vmatpush1.xpose.msra.mxu0 %v46_v48  ;;  %1109 = vmatpush1.xpose.msra.mxu1 %v48_v49  ;;  %v158_v48 = vld [vmem:[%s4718_s1 + $0x3c0] sm:$0xff]  ;;  %v160_v49 = vld [vmem:[%s4718_s1 + $0x3d0] sm:$0xff] }
  0x1a   :  { %1176 = vmatprep.subr.mxu0 %v143_v50  ;;  %1246 = vmatprep.subr.mxu1 %v145_v51  ;;  %v67_v50 = vld [vmem:[%s4718_s1 + $0xe8] sm:$0xff]  ;;  %v69_v51 = vld [vmem:[%s4718_s1 + $0xf8] sm:$0xff] }
  0x1c   :  { %1073 = vmatmul.mubr.f32.vlgmr.msra.gmra.mxu0 %v286_v38  ;;  %1143 = vmatmul.mubr.f32.vlgmr.msra.gmra.mxu1 %v293_v39  ;;  %v362_v38 = vcombine.high %v354_v31, %v354_v31  ;;  %v363_v39 = vcombine.high %v361_v32, %v361_v32 }
  0x1d   :  { %1177 = vmatpush1.xpose.msra.mxu0 %v142_v55  ;;  %1247 = vmatpush1.xpose.msra.mxu1 %v144_v56  ;;  %v66_v55 = vld [vmem:[%s4718_s1 + $0xe0] sm:$0xff]  ;;  %v68_v56 = vld [vmem:[%s4718_s1 + $0xf0] sm:$0xff] }
  0x1e   :  { %1178 = vmatprep.subr.mxu0 %v51_v57  ;;  %1248 = vmatprep.subr.mxu1 %v53_v58  ;;  %v163_v57 = vld [vmem:[%s4718_s1 + $0x3e8] sm:$0xff]  ;;  %v165_v58 = vld [vmem:[%s4718_s1 + $0x3f8] sm:$0xff] }
  0x1f   :  { %1212 = vmatprep.mubr.f32.mxu0 %v311_v59  ;;  %1282 = vmatprep.mubr.f32.mxu1 %v312_v60  ;;  %v388_v59 = vrot.slane %v23_v47, %v4075_v17  ;;  %v395_v60 = vrot.slane %v381_v54, %v4075_v17 }
  0x21   :  { %1179 = vmatpush1.xpose.msra.mxu0 %v50_v62  ;;  %1249 = vmatpush1.xpose.msra.mxu1 %v52_v63  ;;  %v162_v62 = vld [vmem:[%s4718_s1 + $0x3e0] sm:$0xff]  ;;  %v164_v63 = vld [vmem:[%s4718_s1 + $0x3f0] sm:$0xff] }
  0x22   :  { %1316 = vmatprep.subr.mxu0 %v147_v0  ;;  %1386 = vmatprep.subr.mxu1 %v149_v1  ;;  %v71_v0 = vld [vmem:[%s4718_s1 + $0x108] sm:$0xff]  ;;  %v73_v1 = vld [vmem:[%s4718_s1 + $0x118] sm:$0xff] }
  0x24   :  { %1213 = vmatmul.mubr.f32.vlgmr.msra.gmra.mxu0 %v303_v52  ;;  %1283 = vmatmul.mubr.f32.vlgmr.msra.gmra.mxu1 %v310_v53  ;;  %v379_v52 = vcombine.high %v371_v45, %v371_v45  ;;  %v380_v53 = vcombine.high %v378_v46, %v378_v46 }
  0x25   :  { %1317 = vmatpush1.xpose.msra.mxu0 %v146_v5  ;;  %1387 = vmatpush1.xpose.msra.mxu1 %v148_v6 }
  0x26   :  { %1318 = vmatprep.subr.mxu0 %v55_v7  ;;  %1388 = vmatprep.subr.mxu1 %v57_v8 }
  0x27   :  { %1352 = vmatprep.mubr.f32.mxu0 %v328_v9  ;;  %1422 = vmatprep.mubr.f32.mxu1 %v329_v10 }
  0x29   :  { %1319 = vmatpush1.xpose.msra.mxu0 %v54_v12  ;;  %1389 = vmatpush1.xpose.msra.mxu1 %v56_v13 }
  0x2a   :  { %1456 = vmatprep.subr.mxu0 %v151_v14  ;;  %1526 = vmatprep.subr.mxu1 %v153_v15 }
  0x2c   :  { %1353 = vmatmul.mubr.f32.vlgmr.msra.gmra.mxu0 %v320_v2  ;;  %1423 = vmatmul.mubr.f32.vlgmr.msra.gmra.mxu1 %v327_v3  ;;  %v396_v2 = vcombine.high %v388_v59, %v388_v59  ;;  %v397_v3 = vcombine.high %v395_v60, %v395_v60 }
  0x2d   :  { %1457 = vmatpush1.xpose.msra.mxu0 %v150_v20  ;;  %1527 = vmatpush1.xpose.msra.mxu1 %v152_v21 }
  0x2e   :  { %1458 = vmatprep.subr.mxu0 %v59_v22  ;;  %1528 = vmatprep.subr.mxu1 %v61_v23 }
  0x2f   :  { %1492 = vmatprep.mubr.f32.mxu0 %v345_v24  ;;  %1562 = vmatprep.mubr.f32.mxu1 %v346_v25 }
  0x31   :  { %1459 = vmatpush1.xpose.msra.mxu0 %v58_v27  ;;  %1529 = vmatpush1.xpose.msra.mxu1 %v60_v28 }
  0x32   :  { %1596 = vmatprep.subr.mxu0 %v155_v29  ;;  %1666 = vmatprep.subr.mxu1 %v157_v30 }
  0x34   :  { %1493 = vmatmul.mubr.f32.vlgmr.msra.gmra.mxu0 %v337_v16  ;;  %1563 = vmatmul.mubr.f32.vlgmr.msra.gmra.mxu1 %v344_v18 }
  0x35   :  { %1597 = vmatpush1.xpose.msra.mxu0 %v154_v34  ;;  %1667 = vmatpush1.xpose.msra.mxu1 %v156_v35 }
  0x36   :  { %1598 = vmatprep.subr.mxu0 %v63_v36  ;;  %1668 = vmatprep.subr.mxu1 %v65_v37 }
  0x37   :  { %1632 = vmatprep.mubr.f32.mxu0 %v362_v38  ;;  %1702 = vmatprep.mubr.f32.mxu1 %v363_v39 }
  0x39   :  { %1599 = vmatpush1.xpose.msra.mxu0 %v62_v41  ;;  %1669 = vmatpush1.xpose.msra.mxu1 %v64_v42 }
  0x3a   :  { %1736 = vmatprep.subr.mxu0 %v159_v43  ;;  %1806 = vmatprep.subr.mxu1 %v161_v44 }
  0x3c   :  { %1633 = vmatmul.mubr.f32.vlgmr.msra.gmra.mxu0 %v354_v31  ;;  %1703 = vmatmul.mubr.f32.vlgmr.msra.gmra.mxu1 %v361_v32 }
  0x3d   :  { %1737 = vmatpush1.xpose.msra.mxu0 %v158_v48  ;;  %1807 = vmatpush1.xpose.msra.mxu1 %v160_v49 }
  0x3e   :  { %1738 = vmatprep.subr.mxu0 %v67_v50  ;;  %1808 = vmatprep.subr.mxu1 %v69_v51 }
  0x3f   :  { %1772 = vmatprep.mubr.f32.mxu0 %v379_v52  ;;  %1842 = vmatprep.mubr.f32.mxu1 %v380_v53 }
  0x41   :  { %1739 = vmatpush1.xpose.msra.mxu0 %v66_v55  ;;  %1809 = vmatpush1.xpose.msra.mxu1 %v68_v56 }
  0x42   :  { %1876 = vmatprep.subr.mxu0 %v163_v57  ;;  %1946 = vmatprep.subr.mxu1 %v165_v58 }
  0x44   :  { %1773 = vmatmul.mubr.f32.vlgmr.msra.gmra.mxu0 %v371_v45  ;;  %1843 = vmatmul.mubr.f32.vlgmr.msra.gmra.mxu1 %v378_v46 }
  0x45   :  { %1877 = vmatpush1.xpose.msra.mxu0 %v162_v62  ;;  %1947 = vmatpush1.xpose.msra.mxu1 %v164_v63 }
  0x46   :  { %8 = vsyncpa [#allocation3], 0  ;;  %1878 = vmatprep.subr.mxu0 %v71_v0  ;;  %1948 = vmatprep.subr.mxu1 %v73_v1  ;;  %v70_v5 = vld [vmem:[%s4718_s1 + $0x100] sm:$0xff]  ;;  %v72_v6 = vld [vmem:[%s4718_s1 + $0x110] sm:$0xff]  ;;  %v405_v9 = vrot.slane %v24_v61, %v4075_v17  ;;  %v412_v10 = vrot.slane %v398_v4, %v4075_v17  ;;  %s4021_s21 = smov [#allocation2]   ;;  %vm3956_vm0 = vcmask 74752  }
  0x47   :  { %1912 = vmatprep.mubr.f32.mxu0 %v396_v2  ;;  %1982 = vmatprep.mubr.f32.mxu1 %v397_v3  ;;  %v167_v7 = vld [vmem:[%s4718_s1 + $0x408] sm:$0xff]  ;;  %v169_v8 = vld [vmem:[%s4718_s1 + $0x418] sm:$0xff]  ;;  %v25_v11 = vld [vmem:[%s4717_s0 + $0x50] sm:$0xff]  ;;  %s3964_s22 = sshll.u32 %s4021_s21, 4  ;;  %s3965_s22 = int_to_ptr.vmem [resolvable:$true] %s3964_s22 }
  0x48   :  { %v166_v12 = vld [vmem:[%s4718_s1 + $0x400] sm:$0xff]  ;;  %v168_v13 = vld [vmem:[%s4718_s1 + $0x410] sm:$0xff]  ;;  %v75_v14 = vld [vmem:[%s4718_s1 + $0x128] sm:$0xff]  ;;  %v413_v16 = vcombine.high %v405_v9, %v405_v9  ;;  %v414_v18 = vcombine.high %v412_v10, %v412_v10  ;;  %v415_v19 = vcombine.high %v25_v11, %v25_v11  ;;  %v422_v24 = vrot.slane %v25_v11, %v4075_v17  ;;  %s3998_s23 = scalar_lea.vmem %s3965_s22, 32  ;;  %p4003_p1 = scmp.lt.s32.totalorder %s3965_s22, %s3965_s22 }
  0x49   :  { %1879 = vmatpush1.xpose.msra.mxu0 %v70_v5  ;;  %1949 = vmatpush1.xpose.msra.mxu1 %v72_v6  ;;  %v77_v15 = vld [vmem:[%s4718_s1 + $0x138] sm:$0xff]  ;;  %v74_v20 = vld [vmem:[%s4718_s1 + $0x120] sm:$0xff]  ;;  %v76_v21 = vld [vmem:[%s4718_s1 + $0x130] sm:$0xff]  ;;  %p3999_p0 = scmp.ne.s32.totalorder %s3965_s22, %s3998_s23  ;;  %p4004_p2 = scmp.lt.s32.totalorder %s3998_s23, %s3998_s23 }
  0x4a   :  { %2016 = vmatprep.subr.mxu0 %v167_v7  ;;  %2086 = vmatprep.subr.mxu1 %v169_v8  ;;  %v171_v22 = vld [vmem:[%s4718_s1 + $0x428] sm:$0xff]  ;;  %v173_v23 = vld [vmem:[%s4718_s1 + $0x438] sm:$0xff]  ;;  %v429_v25 = vrot.slane %v415_v19, %v4075_v17  ;;  %v170_v27 = vld [vmem:[%s4718_s1 + $0x420] sm:$0xff]  ;;  %v430_v31 = vcombine.high %v422_v24, %v422_v24 }
  0x4b   :  { %v26_v26 = vld [vmem:[%s4717_s0 + $0x58] sm:$0xff]  ;;  %v172_v28 = vld [vmem:[%s4718_s1 + $0x430] sm:$0xff]  ;;  %v79_v29 = vld [vmem:[%s4718_s1 + $0x148] sm:$0xff]  ;;  %p4005_p3 = por %p4004_p2, %p4003_p1 }
  0x4c   :  { %1913 = vmatmul.mubr.f32.vlgmr.msra.gmra.mxu0 %v388_v59  ;;  %1983 = vmatmul.mubr.f32.vlgmr.msra.gmra.mxu1 %v395_v60  ;;  %v81_v30 = vld [vmem:[%s4718_s1 + $0x158] sm:$0xff]  ;;  %v431_v32 = vcombine.high %v429_v25, %v429_v25  ;;  %v432_v33 = vcombine.high %v26_v26, %v26_v26  ;;  %v78_v34 = vld [vmem:[%s4718_s1 + $0x140] sm:$0xff]  ;;  %v80_v35 = vld [vmem:[%s4718_s1 + $0x150] sm:$0xff]  ;;  %v439_v38 = vrot.slane %v26_v26, %v4075_v17 }
  0x4d   :  { %2017 = vmatpush1.xpose.msra.mxu0 %v166_v12  ;;  %2087 = vmatpush1.xpose.msra.mxu1 %v168_v13  ;;  %v175_v36 = vld [vmem:[%s4718_s1 + $0x448] sm:$0xff]  ;;  %v177_v37 = vld [vmem:[%s4718_s1 + $0x458] sm:$0xff]  ;;  %v27_v40 = vld [vmem:[%s4717_s0 + $0x60] sm:$0xff]  ;;  %p4006_p4 = pnand %p4005_p3, %p3999_p0 }
  0x4e   :  { %2018 = vmatprep.subr.mxu0 %v75_v14  ;;  %2088 = vmatprep.subr.mxu1 %v77_v15  ;;  %v446_v39 = vrot.slane %v432_v33, %v4075_v17  ;;  %v174_v41 = vld [vmem:[%s4718_s1 + $0x440] sm:$0xff]  ;;  %v176_v42 = vld [vmem:[%s4718_s1 + $0x450] sm:$0xff]  ;;  %v83_v43 = vld [vmem:[%s4718_s1 + $0x168] sm:$0xff]  ;;  %v447_v45 = vcombine.high %v439_v38, %v439_v38  ;;  %v449_v47 = vcombine.high %v27_v40, %v27_v40 }
  0x4f   :  { %2052 = vmatprep.mubr.f32.mxu0 %v413_v16  ;;  %2122 = vmatprep.mubr.f32.mxu1 %v414_v18  ;;  %v85_v44 = vld [vmem:[%s4718_s1 + $0x178] sm:$0xff]  ;;  %v82_v48 = vld [vmem:[%s4718_s1 + $0x160] sm:$0xff]  ;;  %v84_v49 = vld [vmem:[%s4718_s1 + $0x170] sm:$0xff]  ;;  %v456_v52 = vrot.slane %v27_v40, %v4075_v17 }
  0x50   :  { %v448_v46 = vcombine.high %v446_v39, %v446_v39  ;;  %v179_v50 = vld [vmem:[%s4718_s1 + $0x468] sm:$0xff]  ;;  %v181_v51 = vld [vmem:[%s4718_s1 + $0x478] sm:$0xff]  ;;  %v463_v53 = vrot.slane %v449_v47, %v4075_v17  ;;  %v178_v55 = vld [vmem:[%s4718_s1 + $0x460] sm:$0xff] }
  0x51   :  { %2019 = vmatpush1.xpose.msra.mxu0 %v74_v20  ;;  %2089 = vmatpush1.xpose.msra.mxu1 %v76_v21  ;;  %v28_v54 = vld [vmem:[%s4717_s0 + $0x68] sm:$0xff]  ;;  %v180_v56 = vld [vmem:[%s4718_s1 + $0x470] sm:$0xff]  ;;  %v89_v58 = vld [vmem:[%s4718_s1 + $0x198] sm:$0xff]  ;;  %v464_v59 = vcombine.high %v456_v52, %v456_v52 }
  0x52   :  { %2156 = vmatprep.subr.mxu0 %v171_v22  ;;  %2226 = vmatprep.subr.mxu1 %v173_v23  ;;  %v87_v57 = vld [vmem:[%s4718_s1 + $0x188] sm:$0xff]  ;;  %v465_v60 = vcombine.high %v463_v53, %v463_v53  ;;  %v466_v61 = vcombine.high %v28_v54, %v28_v54  ;;  %v86_v62 = vld [vmem:[%s4718_s1 + $0x180] sm:$0xff]  ;;  %v88_v63 = vld [vmem:[%s4718_s1 + $0x190] sm:$0xff]  ;;  %v473_v2 = vrot.slane %v28_v54, %v4075_v17 }
  0x53   :  { %v183_v0 = vld [vmem:[%s4718_s1 + $0x488] sm:$0xff]  ;;  %v185_v1 = vld [vmem:[%s4718_s1 + $0x498] sm:$0xff]  ;;  %v29_v4 = vld [vmem:[%s4717_s0 + $0x70] sm:$0xff] }
  0x54   :  { %2053 = vmatmul.mubr.f32.vlgmr.msra.gmra.mxu0 %v405_v9  ;;  %2123 = vmatmul.mubr.f32.vlgmr.msra.gmra.mxu1 %v412_v10  ;;  %v480_v3 = vrot.slane %v466_v61, %v4075_v17  ;;  %v182_v5 = vld [vmem:[%s4718_s1 + $0x480] sm:$0xff]  ;;  %v184_v6 = vld [vmem:[%s4718_s1 + $0x490] sm:$0xff]  ;;  %v91_v7 = vld [vmem:[%s4718_s1 + $0x1a8] sm:$0xff]  ;;  %v481_v9 = vcombine.high %v473_v2, %v473_v2  ;;  %v483_v11 = vcombine.high %v29_v4, %v29_v4 }
  0x55   :  { %2157 = vmatpush1.xpose.msra.mxu0 %v170_v27  ;;  %2227 = vmatpush1.xpose.msra.mxu1 %v172_v28  ;;  %v93_v8 = vld [vmem:[%s4718_s1 + $0x1b8] sm:$0xff]  ;;  %v90_v12 = vld [vmem:[%s4718_s1 + $0x1a0] sm:$0xff]  ;;  %v92_v13 = vld [vmem:[%s4718_s1 + $0x1b0] sm:$0xff]  ;;  %v490_v16 = vrot.slane %v29_v4, %v4075_v17 }
  0x56   :  { %2158 = vmatprep.subr.mxu0 %v79_v29  ;;  %2228 = vmatprep.subr.mxu1 %v81_v30  ;;  %v482_v10 = vcombine.high %v480_v3, %v480_v3  ;;  %v187_v14 = vld [vmem:[%s4718_s1 + $0x4a8] sm:$0xff]  ;;  %v189_v15 = vld [vmem:[%s4718_s1 + $0x4b8] sm:$0xff]  ;;  %v497_v18 = vrot.slane %v483_v11, %v4075_v17  ;;  %v186_v20 = vld [vmem:[%s4718_s1 + $0x4a0] sm:$0xff] }
  0x57   :  { %2192 = vmatprep.mubr.f32.mxu0 %v430_v31  ;;  %2262 = vmatprep.mubr.f32.mxu1 %v431_v32  ;;  %v30_v19 = vld [vmem:[%s4717_s0 + $0x78] sm:$0xff]  ;;  %v188_v21 = vld [vmem:[%s4718_s1 + $0x4b0] sm:$0xff]  ;;  %v95_v22 = vld [vmem:[%s4718_s1 + $0x1c8] sm:$0xff] }
  0x58   :  { %v97_v23 = vld [vmem:[%s4718_s1 + $0x1d8] sm:$0xff]  ;;  %v500_v26 = vcombine.high %v30_v19, %v30_v19  ;;  %v94_v27 = vld [vmem:[%s4718_s1 + $0x1c0] sm:$0xff]  ;;  %v96_v28 = vld [vmem:[%s4718_s1 + $0x1d0] sm:$0xff]  ;;  %v507_v31 = vrot.slane %v30_v19, %v4075_v17 }
  0x59   :  { %2159 = vmatpush1.xpose.msra.mxu0 %v78_v34  ;;  %2229 = vmatpush1.xpose.msra.mxu1 %v80_v35  ;;  %v191_v29 = vld [vmem:[%s4718_s1 + $0x4c8] sm:$0xff]  ;;  %v193_v30 = vld [vmem:[%s4718_s1 + $0x4d8] sm:$0xff]  ;;  %v31_v33 = vld [vmem:[%s4717_s0 + $0x80] sm:$0xff] }
  0x5a   :  { %2296 = vmatprep.subr.mxu0 %v175_v36  ;;  %2366 = vmatprep.subr.mxu1 %v177_v37  ;;  %v514_v32 = vrot.slane %v500_v26, %v4075_v17  ;;  %v190_v34 = vld [vmem:[%s4718_s1 + $0x4c0] sm:$0xff]  ;;  %v192_v35 = vld [vmem:[%s4718_s1 + $0x4d0] sm:$0xff]  ;;  %v99_v36 = vld [vmem:[%s4718_s1 + $0x1e8] sm:$0xff]  ;;  %v517_v40 = vcombine.high %v31_v33, %v31_v33 }
  0x5b   :  { %v101_v37 = vld [vmem:[%s4718_s1 + $0x1f8] sm:$0xff]  ;;  %v32_v47 = vld [vmem:[%s4717_s0 + $0x88] sm:$0xff]  ;;  %v33_v61 = vld [vmem:[%s4717_s0 + $0x90] sm:$0xff] }
  0x5c   :  { %2193 = vmatmul.mubr.f32.vlgmr.msra.gmra.mxu0 %v422_v24  ;;  %2263 = vmatmul.mubr.f32.vlgmr.msra.gmra.mxu1 %v429_v25  ;;  %v498_v24 = vcombine.high %v490_v16, %v490_v16  ;;  %v499_v25 = vcombine.high %v497_v18, %v497_v18  ;;  %v534_v54 = vcombine.high %v32_v47, %v32_v47  ;;  %v34_v11 = vld [vmem:[%s4717_s0 + $0x98] sm:$0xff]  ;;  %v35_v26 = vld [vmem:[%s4717_s0 + $0xa0] sm:$0xff] }
  0x5d   :  { %2297 = vmatpush1.xpose.msra.mxu0 %v174_v41  ;;  %2367 = vmatpush1.xpose.msra.mxu1 %v176_v42  ;;  %v98_v41 = vld [vmem:[%s4718_s1 + $0x1e0] sm:$0xff]  ;;  %v100_v42 = vld [vmem:[%s4718_s1 + $0x1f0] sm:$0xff]  ;;  %v551_v4 = vcombine.high %v33_v61, %v33_v61  ;;  %v568_v19 = vcombine.high %v34_v11, %v34_v11 }
  0x5e   :  { %2298 = vmatprep.subr.mxu0 %v83_v43  ;;  %2368 = vmatprep.subr.mxu1 %v85_v44  ;;  %v195_v43 = vld [vmem:[%s4718_s1 + $0x4e8] sm:$0xff]  ;;  %v197_v44 = vld [vmem:[%s4718_s1 + $0x4f8] sm:$0xff] }
  0x5f   :  { %2332 = vmatprep.mubr.f32.mxu0 %v447_v45  ;;  %2402 = vmatprep.mubr.f32.mxu1 %v448_v46  ;;  %v524_v45 = vrot.slane %v31_v33, %v4075_v17  ;;  %v531_v46 = vrot.slane %v517_v40, %v4075_v17  ;;  %v585_v33 = vcombine.high %v35_v26, %v35_v26  ;;  %v36_v40 = vld [vmem:[%s4717_s0 + $0xa8] sm:$0xff] }
  0x61   :  { %2299 = vmatpush1.xpose.msra.mxu0 %v82_v48  ;;  %2369 = vmatpush1.xpose.msra.mxu1 %v84_v49  ;;  %v194_v48 = vld [vmem:[%s4718_s1 + $0x4e0] sm:$0xff]  ;;  %v196_v49 = vld [vmem:[%s4718_s1 + $0x4f0] sm:$0xff] }
  0x62   :  { %2436 = vmatprep.subr.mxu0 %v179_v50  ;;  %2506 = vmatprep.subr.mxu1 %v181_v51  ;;  %v103_v50 = vld [vmem:[%s4718_s1 + $0x208] sm:$0xff]  ;;  %v105_v51 = vld [vmem:[%s4718_s1 + $0x218] sm:$0xff] }
  0x64   :  { %2333 = vmatmul.mubr.f32.vlgmr.msra.gmra.mxu0 %v439_v38  ;;  %2403 = vmatmul.mubr.f32.vlgmr.msra.gmra.mxu1 %v446_v39  ;;  %v515_v38 = vcombine.high %v507_v31, %v507_v31  ;;  %v516_v39 = vcombine.high %v514_v32, %v514_v32 }
  0x65   :  { %2437 = vmatpush1.xpose.msra.mxu0 %v178_v55  ;;  %2507 = vmatpush1.xpose.msra.mxu1 %v180_v56  ;;  %v102_v55 = vld [vmem:[%s4718_s1 + $0x200] sm:$0xff]  ;;  %v104_v56 = vld [vmem:[%s4718_s1 + $0x210] sm:$0xff] }
  0x66   :  { %2438 = vmatprep.subr.mxu0 %v87_v57  ;;  %2508 = vmatprep.subr.mxu1 %v89_v58  ;;  %v199_v57 = vld [vmem:[%s4718_s1 + $0x508] sm:$0xff]  ;;  %v201_v58 = vld [vmem:[%s4718_s1 + $0x518] sm:$0xff] }
  0x67   :  { %2472 = vmatprep.mubr.f32.mxu0 %v464_v59  ;;  %2542 = vmatprep.mubr.f32.mxu1 %v465_v60  ;;  %v541_v59 = vrot.slane %v32_v47, %v4075_v17  ;;  %v548_v60 = vrot.slane %v534_v54, %v4075_v17  ;;  %v602_v47 = vcombine.high %v36_v40, %v36_v40  ;;  %v37_v54 = vld [vmem:[%s4717_s0 + $0xb0] sm:$0xff] }
  0x69   :  { %2439 = vmatpush1.xpose.msra.mxu0 %v86_v62  ;;  %2509 = vmatpush1.xpose.msra.mxu1 %v88_v63  ;;  %v198_v62 = vld [vmem:[%s4718_s1 + $0x500] sm:$0xff]  ;;  %v200_v63 = vld [vmem:[%s4718_s1 + $0x510] sm:$0xff] }
  0x6a   :  { %2576 = vmatprep.subr.mxu0 %v183_v0  ;;  %2646 = vmatprep.subr.mxu1 %v185_v1  ;;  %v107_v0 = vld [vmem:[%s4718_s1 + $0x228] sm:$0xff]  ;;  %v109_v1 = vld [vmem:[%s4718_s1 + $0x238] sm:$0xff] }
  0x6c   :  { %2473 = vmatmul.mubr.f32.vlgmr.msra.gmra.mxu0 %v456_v52  ;;  %2543 = vmatmul.mubr.f32.vlgmr.msra.gmra.mxu1 %v463_v53  ;;  %v532_v52 = vcombine.high %v524_v45, %v524_v45  ;;  %v533_v53 = vcombine.high %v531_v46, %v531_v46 }
  0x6d   :  { %2577 = vmatpush1.xpose.msra.mxu0 %v182_v5  ;;  %2647 = vmatpush1.xpose.msra.mxu1 %v184_v6  ;;  %v106_v5 = vld [vmem:[%s4718_s1 + $0x220] sm:$0xff]  ;;  %v108_v6 = vld [vmem:[%s4718_s1 + $0x230] sm:$0xff] }
  0x6e   :  { %2578 = vmatprep.subr.mxu0 %v91_v7  ;;  %2648 = vmatprep.subr.mxu1 %v93_v8  ;;  %v203_v7 = vld [vmem:[%s4718_s1 + $0x528] sm:$0xff]  ;;  %v205_v8 = vld [vmem:[%s4718_s1 + $0x538] sm:$0xff] }
  0x6f   :  { %2612 = vmatprep.mubr.f32.mxu0 %v481_v9  ;;  %2682 = vmatprep.mubr.f32.mxu1 %v482_v10  ;;  %v558_v9 = vrot.slane %v33_v61, %v4075_v17  ;;  %v565_v10 = vrot.slane %v551_v4, %v4075_v17  ;;  %v619_v61 = vcombine.high %v37_v54, %v37_v54  ;;  %v218_v4 = vld [vmem:[%s4718_s1 + $0x5a0] sm:$0xff] }
  0x71   :  { %2579 = vmatpush1.xpose.msra.mxu0 %v90_v12  ;;  %2649 = vmatpush1.xpose.msra.mxu1 %v92_v13  ;;  %v202_v12 = vld [vmem:[%s4718_s1 + $0x520] sm:$0xff]  ;;  %v204_v13 = vld [vmem:[%s4718_s1 + $0x530] sm:$0xff] }
  0x72   :  { %2716 = vmatprep.subr.mxu0 %v187_v14  ;;  %2786 = vmatprep.subr.mxu1 %v189_v15  ;;  %v111_v14 = vld [vmem:[%s4718_s1 + $0x248] sm:$0xff]  ;;  %v113_v15 = vld [vmem:[%s4718_s1 + $0x258] sm:$0xff] }
  0x74   :  { %2613 = vmatmul.mubr.f32.vlgmr.msra.gmra.mxu0 %v473_v2  ;;  %2683 = vmatmul.mubr.f32.vlgmr.msra.gmra.mxu1 %v480_v3  ;;  %v549_v2 = vcombine.high %v541_v59, %v541_v59  ;;  %v550_v3 = vcombine.high %v548_v60, %v548_v60 }
  0x75   :  { %2717 = vmatpush1.xpose.msra.mxu0 %v186_v20  ;;  %2787 = vmatpush1.xpose.msra.mxu1 %v188_v21  ;;  %v110_v20 = vld [vmem:[%s4718_s1 + $0x240] sm:$0xff]  ;;  %v112_v21 = vld [vmem:[%s4718_s1 + $0x250] sm:$0xff] }
  0x76   :  { %2718 = vmatprep.subr.mxu0 %v95_v22  ;;  %2788 = vmatprep.subr.mxu1 %v97_v23  ;;  %v207_v22 = vld [vmem:[%s4718_s1 + $0x548] sm:$0xff]  ;;  %v209_v23 = vld [vmem:[%s4718_s1 + $0x558] sm:$0xff] }
  0x77   :  { %2752 = vmatprep.mubr.f32.mxu0 %v498_v24  ;;  %2822 = vmatprep.mubr.f32.mxu1 %v499_v25  ;;  %v575_v24 = vrot.slane %v34_v11, %v4075_v17  ;;  %v582_v25 = vrot.slane %v568_v19, %v4075_v17 }
  0x79   :  { %2719 = vmatpush1.xpose.msra.mxu0 %v94_v27  ;;  %2789 = vmatpush1.xpose.msra.mxu1 %v96_v28  ;;  %v206_v27 = vld [vmem:[%s4718_s1 + $0x540] sm:$0xff]  ;;  %v208_v28 = vld [vmem:[%s4718_s1 + $0x550] sm:$0xff] }
  0x7a   :  { %2856 = vmatprep.subr.mxu0 %v191_v29  ;;  %2926 = vmatprep.subr.mxu1 %v193_v30  ;;  %v115_v29 = vld [vmem:[%s4718_s1 + $0x268] sm:$0xff]  ;;  %v117_v30 = vld [vmem:[%s4718_s1 + $0x278] sm:$0xff] }
  0x7c   :  { %2753 = vmatmul.mubr.f32.vlgmr.msra.gmra.mxu0 %v490_v16  ;;  %2823 = vmatmul.mubr.f32.vlgmr.msra.gmra.mxu1 %v497_v18  ;;  %v566_v16 = vcombine.high %v558_v9, %v558_v9  ;;  %v567_v18 = vcombine.high %v565_v10, %v565_v10 }
  0x7d   :  { %2857 = vmatpush1.xpose.msra.mxu0 %v190_v34  ;;  %2927 = vmatpush1.xpose.msra.mxu1 %v192_v35  ;;  %v114_v34 = vld [vmem:[%s4718_s1 + $0x260] sm:$0xff]  ;;  %v116_v35 = vld [vmem:[%s4718_s1 + $0x270] sm:$0xff] }
  0x7e   :  { %2858 = vmatprep.subr.mxu0 %v99_v36  ;;  %2928 = vmatprep.subr.mxu1 %v101_v37  ;;  %v211_v36 = vld [vmem:[%s4718_s1 + $0x568] sm:$0xff]  ;;  %v213_v37 = vld [vmem:[%s4718_s1 + $0x578] sm:$0xff] }
  0x7f   :  { %2892 = vmatprep.mubr.f32.mxu0 %v515_v38  ;;  %2962 = vmatprep.mubr.f32.mxu1 %v516_v39  ;;  %v592_v38 = vrot.slane %v35_v26, %v4075_v17  ;;  %v599_v39 = vrot.slane %v585_v33, %v4075_v17 }
  0x81   :  { %2859 = vmatpush1.xpose.msra.mxu0 %v98_v41  ;;  %2929 = vmatpush1.xpose.msra.mxu1 %v100_v42  ;;  %v210_v41 = vld [vmem:[%s4718_s1 + $0x560] sm:$0xff]  ;;  %v212_v42 = vld [vmem:[%s4718_s1 + $0x570] sm:$0xff] }
  0x82   :  { %2996 = vmatprep.subr.mxu0 %v195_v43  ;;  %3066 = vmatprep.subr.mxu1 %v197_v44  ;;  %v119_v43 = vld [vmem:[%s4718_s1 + $0x288] sm:$0xff]  ;;  %v121_v44 = vld [vmem:[%s4718_s1 + $0x298] sm:$0xff] }
  0x84   :  { %2893 = vmatmul.mubr.f32.vlgmr.msra.gmra.mxu0 %v507_v31  ;;  %2963 = vmatmul.mubr.f32.vlgmr.msra.gmra.mxu1 %v514_v32  ;;  %v583_v31 = vcombine.high %v575_v24, %v575_v24  ;;  %v584_v32 = vcombine.high %v582_v25, %v582_v25 }
  0x85   :  { %2997 = vmatpush1.xpose.msra.mxu0 %v194_v48  ;;  %3067 = vmatpush1.xpose.msra.mxu1 %v196_v49  ;;  %v118_v48 = vld [vmem:[%s4718_s1 + $0x280] sm:$0xff]  ;;  %v120_v49 = vld [vmem:[%s4718_s1 + $0x290] sm:$0xff] }
  0x86   :  { %2998 = vmatprep.subr.mxu0 %v103_v50  ;;  %3068 = vmatprep.subr.mxu1 %v105_v51  ;;  %v215_v50 = vld [vmem:[%s4718_s1 + $0x588] sm:$0xff]  ;;  %v217_v51 = vld [vmem:[%s4718_s1 + $0x598] sm:$0xff] }
  0x87   :  { %3032 = vmatprep.mubr.f32.mxu0 %v532_v52  ;;  %3102 = vmatprep.mubr.f32.mxu1 %v533_v53  ;;  %v609_v52 = vrot.slane %v36_v40, %v4075_v17  ;;  %v616_v53 = vrot.slane %v602_v47, %v4075_v17 }
  0x89   :  { %2999 = vmatpush1.xpose.msra.mxu0 %v102_v55  ;;  %3069 = vmatpush1.xpose.msra.mxu1 %v104_v56  ;;  %v214_v55 = vld [vmem:[%s4718_s1 + $0x580] sm:$0xff]  ;;  %v216_v56 = vld [vmem:[%s4718_s1 + $0x590] sm:$0xff] }
  0x8a   :  { %3136 = vmatprep.subr.mxu0 %v199_v57  ;;  %3206 = vmatprep.subr.mxu1 %v201_v58  ;;  %v123_v57 = vld [vmem:[%s4718_s1 + $0x2a8] sm:$0xff]  ;;  %v125_v58 = vld [vmem:[%s4718_s1 + $0x2b8] sm:$0xff] }
  0x8c   :  { %3033 = vmatmul.mubr.f32.vlgmr.msra.gmra.mxu0 %v524_v45  ;;  %3103 = vmatmul.mubr.f32.vlgmr.msra.gmra.mxu1 %v531_v46  ;;  %v600_v45 = vcombine.high %v592_v38, %v592_v38  ;;  %v601_v46 = vcombine.high %v599_v39, %v599_v39 }
  0x8d   :  { %3137 = vmatpush1.xpose.msra.mxu0 %v198_v62  ;;  %3207 = vmatpush1.xpose.msra.mxu1 %v200_v63  ;;  %v122_v62 = vld [vmem:[%s4718_s1 + $0x2a0] sm:$0xff]  ;;  %v124_v63 = vld [vmem:[%s4718_s1 + $0x2b0] sm:$0xff] }
  0x8e   :  { %3138 = vmatprep.subr.mxu0 %v107_v0  ;;  %3208 = vmatprep.subr.mxu1 %v109_v1  ;;  %v219_v0 = vld [vmem:[%s4718_s1 + $0x5a8] sm:$0xff]  ;;  %v221_v1 = vld [vmem:[%s4718_s1 + $0x5b8] sm:$0xff] }
  0x8f   :  { %3172 = vmatprep.mubr.f32.mxu0 %v549_v2  ;;  %3242 = vmatprep.mubr.f32.mxu1 %v550_v3  ;;  %v626_v2 = vrot.slane %v37_v54, %v4075_v17  ;;  %v633_v3 = vrot.slane %v619_v61, %v4075_v17  ;;  %v129_v17 = vld [vmem:[%s4718_s1 + $0x2d8] sm:$0xff] }
  0x91   :  { %3139 = vmatpush1.xpose.msra.mxu0 %v106_v5  ;;  %3209 = vmatpush1.xpose.msra.mxu1 %v108_v6  ;;  %v220_v5 = vld [vmem:[%s4718_s1 + $0x5b0] sm:$0xff]  ;;  %v127_v6 = vld [vmem:[%s4718_s1 + $0x2c8] sm:$0xff] }
  0x92   :  { %3276 = vmatprep.subr.mxu0 %v203_v7  ;;  %3346 = vmatprep.subr.mxu1 %v205_v8  ;;  %v634_v7 = vcombine.high %v626_v2, %v626_v2  ;;  %v635_v8 = vcombine.high %v633_v3, %v633_v3 }
  0x94   :  { %3173 = vmatmul.mubr.f32.vlgmr.msra.gmra.mxu0 %v541_v59  ;;  %3243 = vmatmul.mubr.f32.vlgmr.msra.gmra.mxu1 %v548_v60  ;;  %v617_v59 = vcombine.high %v609_v52, %v609_v52  ;;  %v618_v60 = vcombine.high %v616_v53, %v616_v53 }
  0x95   :  { %3277 = vmatpush1.xpose.msra.mxu0 %v202_v12  ;;  %3347 = vmatpush1.xpose.msra.mxu1 %v204_v13 }
  0x96   :  { %3278 = vmatprep.subr.mxu0 %v111_v14  ;;  %3348 = vmatprep.subr.mxu1 %v113_v15 }
  0x97   :  { %3312 = vmatprep.mubr.f32.mxu0 %v566_v16  ;;  %3382 = vmatprep.mubr.f32.mxu1 %v567_v18 }
  0x99   :  { %3279 = vmatpush1.xpose.msra.mxu0 %v110_v20  ;;  %3349 = vmatpush1.xpose.msra.mxu1 %v112_v21 }
  0x9a   :  { %3416 = vmatprep.subr.mxu0 %v207_v22  ;;  %3486 = vmatprep.subr.mxu1 %v209_v23 }
  0x9c   :  { %3313 = vmatmul.mubr.f32.vlgmr.msra.gmra.mxu0 %v558_v9  ;;  %3383 = vmatmul.mubr.f32.vlgmr.msra.gmra.mxu1 %v565_v10  ;;  %v126_v9 = vld [vmem:[%s4718_s1 + $0x2c0] sm:$0xff]  ;;  %v128_v10 = vld [vmem:[%s4718_s1 + $0x2d0] sm:$0xff] }
  0x9d   :  { %3417 = vmatpush1.xpose.msra.mxu0 %v206_v27  ;;  %3487 = vmatpush1.xpose.msra.mxu1 %v208_v28 }
  0x9e   :  { %3418 = vmatprep.subr.mxu0 %v115_v29  ;;  %3488 = vmatprep.subr.mxu1 %v117_v30 }
  0x9f   :  { %3452 = vmatprep.mubr.f32.mxu0 %v583_v31  ;;  %3522 = vmatprep.mubr.f32.mxu1 %v584_v32 }
  0xa1   :  { %3419 = vmatpush1.xpose.msra.mxu0 %v114_v34  ;;  %3489 = vmatpush1.xpose.msra.mxu1 %v116_v35 }
  0xa2   :  { %3556 = vmatprep.subr.mxu0 %v211_v36  ;;  %3626 = vmatprep.subr.mxu1 %v213_v37 }
  0xa4   :  { %3453 = vmatmul.mubr.f32.vlgmr.msra.gmra.mxu0 %v575_v24  ;;  %3523 = vmatmul.mubr.f32.vlgmr.msra.gmra.mxu1 %v582_v25 }
  0xa5   :  { %3557 = vmatpush1.xpose.msra.mxu0 %v210_v41  ;;  %3627 = vmatpush1.xpose.msra.mxu1 %v212_v42 }
  0xa6   :  { %3558 = vmatprep.subr.mxu0 %v119_v43  ;;  %3628 = vmatprep.subr.mxu1 %v121_v44 }
  0xa7   :  { %3592 = vmatprep.mubr.f32.mxu0 %v600_v45  ;;  %3662 = vmatprep.mubr.f32.mxu1 %v601_v46 }
  0xa9   :  { %3559 = vmatpush1.xpose.msra.mxu0 %v118_v48  ;;  %3629 = vmatpush1.xpose.msra.mxu1 %v120_v49 }
  0xaa   :  { %3696 = vmatprep.subr.mxu0 %v215_v50  ;;  %3766 = vmatprep.subr.mxu1 %v217_v51 }
  0xac   :  { %3593 = vmatmul.mubr.f32.vlgmr.msra.gmra.mxu0 %v592_v38  ;;  %3663 = vmatmul.mubr.f32.vlgmr.msra.gmra.mxu1 %v599_v39 }
  0xad   :  { %3697 = vmatpush1.xpose.msra.mxu0 %v214_v55  ;;  %3767 = vmatpush1.xpose.msra.mxu1 %v216_v56 }
  0xae   :  { %3698 = vmatprep.subr.mxu0 %v123_v57  ;;  %3768 = vmatprep.subr.mxu1 %v125_v58 }
  0xaf   :  { %3732 = vmatprep.mubr.f32.mxu0 %v617_v59  ;;  %3802 = vmatprep.mubr.f32.mxu1 %v618_v60 }
  0xb1   :  { %3699 = vmatpush1.xpose.msra.mxu0 %v122_v62  ;;  %3769 = vmatpush1.xpose.msra.mxu1 %v124_v63 }
  0xb2   :  { %3836 = vmatprep.subr.mxu0 %v219_v0  ;;  %3906 = vmatprep.subr.mxu1 %v221_v1 }
  0xb4   :  { %3733 = vmatmul.mubr.f32.vlgmr.msra.gmra.mxu0 %v609_v52  ;;  %3803 = vmatmul.mubr.f32.vlgmr.msra.gmra.mxu1 %v616_v53 }
  0xb5   :  { %3837 = vmatpush1.xpose.msra.mxu0 %v218_v4  ;;  %3907 = vmatpush1.xpose.msra.mxu1 %v220_v5 }
  0xb6   :  { %3838 = vmatprep.subr.mxu0 %v127_v6  ;;  %3908 = vmatprep.subr.mxu1 %v129_v17 }
  0xb7   :  { %3872 = vmatprep.mubr.f32.mxu0 %v634_v7  ;;  %3942 = vmatprep.mubr.f32.mxu1 %v635_v8 }
  0xb9   :  { %3839 = vmatpush1.xpose.msra.mxu0 %v126_v9  ;;  %3909 = vmatpush1.xpose.msra.mxu1 %v128_v10 }
  0xbc   :  { %3873 = vmatmul.mubr.f32.vlgmr.msra.gmra.mxu0 %v626_v2  ;;  %3943 = vmatmul.mubr.f32.vlgmr.msra.gmra.mxu1 %v633_v3 }
  0xcc   :  { %v794_v11 = vpop.f32.mrf.mxu0  ;;  %v864_v12 = vpop.f32.mrf.mxu1 }
  0xcd   :  { %v865_v13 = vadd.f32 %v864_v12, %v794_v11 }
  0xce   :  { %v796_v14 = vpop.f32.mrf.mxu0  ;;  %v866_v15 = vpop.f32.mrf.mxu1 }
  0xd4   :  { %v934_v16 = vpop.f32.mrf.mxu0  ;;  %v1004_v18 = vpop.f32.mrf.mxu1 }
  0xd5   :  { %v935_v19 = vadd.f32 %v934_v16, %v865_v13 }
  0xd6   :  { %v936_v20 = vpop.f32.mrf.mxu0  ;;  %v1006_v21 = vpop.f32.mrf.mxu1 }
  0xd7   :  { %v1005_v22 = vadd.f32 %v1004_v18, %v935_v19 }
  0xdc   :  { %v1074_v23 = vpop.f32.mrf.mxu0  ;;  %v1144_v24 = vpop.f32.mrf.mxu1 }
  0xdd   :  { %v1075_v25 = vadd.f32 %v1074_v23, %v1005_v22 }
  0xde   :  { %v1076_v26 = vpop.f32.mrf.mxu0  ;;  %v1146_v27 = vpop.f32.mrf.mxu1 }
  0xdf   :  { %v1145_v28 = vadd.f32 %v1144_v24, %v1075_v25 }
  0xe4   :  { %v1214_v29 = vpop.f32.mrf.mxu0  ;;  %v1284_v30 = vpop.f32.mrf.mxu1 }
  0xe5   :  { %v1215_v31 = vadd.f32 %v1214_v29, %v1145_v28 }
  0xe6   :  { %v1216_v32 = vpop.f32.mrf.mxu0  ;;  %v1286_v33 = vpop.f32.mrf.mxu1 }
  0xe7   :  { %v1285_v34 = vadd.f32 %v1284_v30, %v1215_v31 }
  0xec   :  { %v1354_v35 = vpop.f32.mrf.mxu0  ;;  %v1424_v36 = vpop.f32.mrf.mxu1 }
  0xed   :  { %v1355_v37 = vadd.f32 %v1354_v35, %v1285_v34 }
  0xee   :  { %v1356_v38 = vpop.f32.mrf.mxu0  ;;  %v1426_v39 = vpop.f32.mrf.mxu1 }
  0xef   :  { %v1425_v40 = vadd.f32 %v1424_v36, %v1355_v37 }
  0xf4   :  { %v1494_v41 = vpop.f32.mrf.mxu0  ;;  %v1564_v42 = vpop.f32.mrf.mxu1 }
  0xf5   :  { %v1495_v43 = vadd.f32 %v1494_v41, %v1425_v40 }
  0xf6   :  { %v1496_v44 = vpop.f32.mrf.mxu0  ;;  %v1566_v45 = vpop.f32.mrf.mxu1 }
  0xf7   :  { %v1565_v46 = vadd.f32 %v1564_v42, %v1495_v43 }
  0xfc   :  { %v1634_v47 = vpop.f32.mrf.mxu0  ;;  %v1704_v48 = vpop.f32.mrf.mxu1 }
  0xfd   :  { %v1635_v49 = vadd.f32 %v1634_v47, %v1565_v46 }
  0xfe   :  { %v1636_v50 = vpop.f32.mrf.mxu0  ;;  %v1706_v51 = vpop.f32.mrf.mxu1 }
  0xff   :  { %v1705_v52 = vadd.f32 %v1704_v48, %v1635_v49 }
 0x104   :  { %v1774_v53 = vpop.f32.mrf.mxu0  ;;  %v1844_v54 = vpop.f32.mrf.mxu1 }
 0x105   :  { %v1775_v5 = vadd.f32 %v1774_v53, %v1705_v52 }
 0x106   :  { %v1776_v55 = vpop.f32.mrf.mxu0  ;;  %v1846_v56 = vpop.f32.mrf.mxu1 }
 0x107   :  { %v1845_v9 = vadd.f32 %v1844_v54, %v1775_v5 }
 0x10c   :  { %v1914_v57 = vpop.f32.mrf.mxu0  ;;  %v1984_v58 = vpop.f32.mrf.mxu1 }
 0x10d   :  { %v1915_v10 = vadd.f32 %v1914_v57, %v1845_v9 }
 0x10e   :  { %v1916_v59 = vpop.f32.mrf.mxu0  ;;  %v1986_v60 = vpop.f32.mrf.mxu1 }
 0x10f   :  { %v1985_v13 = vadd.f32 %v1984_v58, %v1915_v10 }
 0x114   :  { %v2054_v61 = vpop.f32.mrf.mxu0  ;;  %v2124_v62 = vpop.f32.mrf.mxu1 }
 0x115   :  { %v2055_v16 = vadd.f32 %v2054_v61, %v1985_v13 }
 0x116   :  { %v2056_v63 = vpop.f32.mrf.mxu0  ;;  %v2126_v0 = vpop.f32.mrf.mxu1 }
 0x117   :  { %v2125_v18 = vadd.f32 %v2124_v62, %v2055_v16 }
 0x11c   :  { %v2194_v1 = vpop.f32.mrf.mxu0  ;;  %v2264_v2 = vpop.f32.mrf.mxu1 }
 0x11d   :  { %v2195_v21 = vadd.f32 %v2194_v1, %v2125_v18  ;;  %v3972_v18 = vld [vmem:[%s4719_s2] ss:$0 sm:$0xff] }
 0x11e   :  { %v2196_v3 = vpop.f32.mrf.mxu0  ;;  %v2266_v4 = vpop.f32.mrf.mxu1 }
 0x11f   :  { %v2265_v24 = vadd.f32 %v2264_v2, %v2195_v21 }
 0x124   :  { %v2334_v6 = vpop.f32.mrf.mxu0  ;;  %v2404_v17 = vpop.f32.mrf.mxu1 }
 0x125   :  { %v2335_v25 = vadd.f32 %v2334_v6, %v2265_v24 }
 0x126   :  { %v2336_v7 = vpop.f32.mrf.mxu0  ;;  %v2406_v8 = vpop.f32.mrf.mxu1 }
 0x127   :  { %v2405_v30 = vadd.f32 %v2404_v17, %v2335_v25 }
 0x12c   :  { %v2474_v11 = vpop.f32.mrf.mxu0  ;;  %v2544_v12 = vpop.f32.mrf.mxu1 }
 0x12d   :  { %v2475_v31 = vadd.f32 %v2474_v11, %v2405_v30 }
 0x12e   :  { %v2476_v14 = vpop.f32.mrf.mxu0  ;;  %v2546_v15 = vpop.f32.mrf.mxu1 }
 0x12f   :  { %v2545_v34 = vadd.f32 %v2544_v12, %v2475_v31 }
 0x134   :  { %v2614_v19 = vpop.f32.mrf.mxu0  ;;  %v2684_v20 = vpop.f32.mrf.mxu1 }
 0x135   :  { %v2615_v37 = vadd.f32 %v2614_v19, %v2545_v34 }
 0x136   :  { %v2616_v22 = vpop.f32.mrf.mxu0  ;;  %v2686_v23 = vpop.f32.mrf.mxu1 }
 0x137   :  { %v2685_v38 = vadd.f32 %v2684_v20, %v2615_v37 }
 0x13c   :  { %v2754_v26 = vpop.f32.mrf.mxu0  ;;  %v2824_v27 = vpop.f32.mrf.mxu1 }
 0x13d   :  { %v2755_v41 = vadd.f32 %v2754_v26, %v2685_v38 }
 0x13e   :  { %v2756_v28 = vpop.f32.mrf.mxu0  ;;  %v2826_v29 = vpop.f32.mrf.mxu1 }
 0x13f   :  { %v2825_v44 = vadd.f32 %v2824_v27, %v2755_v41 }
 0x144   :  { %v2894_v32 = vpop.f32.mrf.mxu0  ;;  %v2964_v33 = vpop.f32.mrf.mxu1 }
 0x145   :  { %v2895_v45 = vadd.f32 %v2894_v32, %v2825_v44 }
 0x146   :  { %v2896_v35 = vpop.f32.mrf.mxu0  ;;  %v2966_v36 = vpop.f32.mrf.mxu1 }
 0x147   :  { %v2965_v50 = vadd.f32 %v2964_v33, %v2895_v45 }
 0x14c   :  { %v3034_v39 = vpop.f32.mrf.mxu0  ;;  %v3104_v40 = vpop.f32.mrf.mxu1 }
 0x14d   :  { %v3035_v51 = vadd.f32 %v3034_v39, %v2965_v50 }
 0x14e   :  { %v3036_v42 = vpop.f32.mrf.mxu0  ;;  %v3106_v43 = vpop.f32.mrf.mxu1 }
 0x14f   :  { %v3105_v54 = vadd.f32 %v3104_v40, %v3035_v51 }
 0x154   :  { %v3174_v46 = vpop.f32.mrf.mxu0  ;;  %v3244_v47 = vpop.f32.mrf.mxu1 }
 0x155   :  { %v3175_v57 = vadd.f32 %v3174_v46, %v3105_v54 }
 0x156   :  { %v3176_v48 = vpop.f32.mrf.mxu0  ;;  %v3246_v49 = vpop.f32.mrf.mxu1 }
 0x157   :  { %v3245_v58 = vadd.f32 %v3244_v47, %v3175_v57 }
 0x15c   :  { %v3314_v52 = vpop.f32.mrf.mxu0  ;;  %v3384_v53 = vpop.f32.mrf.mxu1 }
 0x15d   :  { %v3315_v61 = vadd.f32 %v3314_v52, %v3245_v58 }
 0x15e   :  { %v3316_v55 = vpop.f32.mrf.mxu0  ;;  %v3386_v56 = vpop.f32.mrf.mxu1 }
 0x15f   :  { %v3385_v0 = vadd.f32 %v3384_v53, %v3315_v61 }
 0x164   :  { %v3454_v59 = vpop.f32.mrf.mxu0  ;;  %v3524_v60 = vpop.f32.mrf.mxu1 }
 0x165   :  { %v3455_v1 = vadd.f32 %v3454_v59, %v3385_v0 }
 0x166   :  { %v3456_v62 = vpop.f32.mrf.mxu0  ;;  %v3526_v63 = vpop.f32.mrf.mxu1 }
 0x167   :  { %v3525_v6 = vadd.f32 %v3524_v60, %v3455_v1 }
 0x16c   :  { %v3594_v2 = vpop.f32.mrf.mxu0  ;;  %v3664_v3 = vpop.f32.mrf.mxu1 }
 0x16d   :  { %v3595_v17 = vadd.f32 %v3594_v2, %v3525_v6 }
 0x16e   :  { %v3596_v4 = vpop.f32.mrf.mxu0  ;;  %v3666_v5 = vpop.f32.mrf.mxu1 }
 0x16f   :  { %v3665_v9 = vadd.f32 %v3664_v3, %v3595_v17 }
 0x174   :  { %v3734_v7 = vpop.f32.mrf.mxu0  ;;  %v3804_v8 = vpop.f32.mrf.mxu1 }
 0x175   :  { %v3735_v12 = vadd.f32 %v3734_v7, %v3665_v9 }
 0x176   :  { %v3736_v10 = vpop.f32.mrf.mxu0  ;;  %v3806_v11 = vpop.f32.mrf.mxu1 }
 0x177   :  { %v3805_v13 = vadd.f32 %v3804_v8, %v3735_v12 }
 0x17c   :  { %v3874_v14 = vpop.f32.mrf.mxu0  ;;  %v3944_v15 = vpop.f32.mrf.mxu1 }
 0x17d   :  { %v3875_v16 = vadd.f32 %v3874_v14, %v3805_v13 }
 0x17e   :  { %v3876_v19 = vpop.f32.mrf.mxu0  ;;  %v3946_v20 = vpop.f32.mrf.mxu1 }
 0x17f   :  { %v3945_v21 = vadd.f32 %v3944_v15, %v3875_v16 }
 0x181   :  { %v3955_v22 = vadd.f32 %v3972_v18, %v3945_v21 }
 0x183   :  { %3957 = vst.msk [vmem:[#allocation2] sm:$0x3] %vm3956_vm0, %v3955_v22 }
 0x184   :  { %4009 = shalt.err (!%p4006_p4)
}
 0x185   :  { %3967 = dma.vmem_to_hbm [thread:$0]  %s3965_s22, 32, %s4720_s3, [#allocation3]  }
 0x186   :  { %4018 = dma.done.wait [#allocation3], 32  }
 0x187   :  { %4019 = vsyncadd [#allocation3], 4294967264 }
 0x188   :  { %3971 = vsyncpa [#allocation3], 1 }

</bundles_post_ra>
